<compile_context>
chip_gen: v5e
topology: v5e:2x2
jax: 0.10.0
libtpu: 0.0.40
codegen_flags: <defaults>
</compile_context>

<pallas_src>
import functools
import math

import jax
import jax.numpy as jnp
from jax import lax
from jax.experimental import pallas as pl
from jax.experimental.pallas import tpu as pltpu

_BLUR_TAPS = (1.0 / 8.0, 3.0 / 8.0, 3.0 / 8.0, 1.0 / 8.0)   # [1,3,3,1]/8, one axis of the blur
_NACC = 4            # independent accumulators ~ one per VALU slot
_SMALL_CIN = 16      # fully unroll the channel loop up to this Cin


# --------------------------------------------------------------------------- kernel helpers
def _channel_sum(w_ref, x_ref, cin):
    """1x1x1 conv with Cout=1 on a lane-dense block: sum_c w[c] * x[0, c]  (f32 accumulation)."""

    def term(c):
        # promote per-block (keeps bf16 on the HBM wire; f32 math on the VPU)
        return x_ref[0, c].astype(jnp.float32) * w_ref[c]

    if cin <= _SMALL_CIN:
        accs = [term(c) for c in range(min(cin, _NACC))]
        for c in range(_NACC, cin):
            accs[c % _NACC] = accs[c % _NACC] + term(c)
    else:
        zero = jnp.zeros(x_ref.shape[2:], dtype=jnp.float32)
        n_grp = cin // _NACC

        def body(g, accs):
            c = g * _NACC
            return tuple(accs[k] + term(c + k) for k in range(_NACC))

        accs = list(lax.fori_loop(0, n_grp, body, (zero,) * _NACC, unroll=2))
        for c in range(n_grp * _NACC, cin):            # ragged tail channels
            accs[c % _NACC] = accs[c % _NACC] + term(c)

    while len(accs) > 1:                               # tree-sum the partial accumulators
        nxt = [accs[i] + accs[i + 1] for i in range(0, len(accs) - 1, 2)]
        if len(accs) % 2:
            nxt.append(accs[-1])
        accs = nxt
    return accs[0]


def _separable_blur(sp, dims):
    """Depthwise [1,3,3,1]^3/512 blur of a zero-padded (d+3, h+3, w+3) f32 volume -> (d, h, w)."""
    d, h, w = dims
    k = _BLUR_TAPS
    # lane (W) axis
    t = (k[0] * sp[:, :, 0:w] + k[1] * sp[:, :, 1:w + 1]
         + k[2] * sp[:, :, 2:w + 2] + k[3] * sp[:, :, 3:w + 3])
    # sublane (H) axis
    t = (k[0] * t[:, 0:h, :] + k[1] * t[:, 1:h + 1, :]
         + k[2] * t[:, 2:h + 2, :] + k[3] * t[:, 3:h + 3, :])
    # leading (D) axis
    t = (k[0] * t[0:d, :, :] + k[1] * t[1:d + 1, :, :]
         + k[2] * t[2:d + 2, :, :] + k[3] * t[3:d + 3, :, :])
    return t


def _torgb_conv_kernel(w_ref, b_ref, x_ref, o_ref, *, cin):
    acc = _channel_sum(w_ref, x_ref, cin) + b_ref[0]
    o_ref[0, 0, :, :] = acc.astype(o_ref.dtype)


def _torgb_conv_blur_kernel(w_ref, b_ref, x_ref, skip_ref, o_ref, *, cin, tile_d, h, w):
    acc = _channel_sum(w_ref, x_ref, cin) + b_ref[0]
    d0 = pl.program_id(1) * tile_d                       # depth offset of this grid step
    sp = skip_ref[0, 0, pl.ds(d0, tile_d + 3), :, :].astype(jnp.float32)
    blurred = _separable_blur(sp, (tile_d, h, w))
    o_ref[0, 0, :, :] = (acc + blurred.reshape(tile_d, h * w)).astype(o_ref.dtype)


# --------------------------------------------------------------------------- glue
def _upscale3d(x, factor=2):
    """Nearest-neighbour x2 upscale (Upscale3d). Plain-JAX glue on the small 1-channel skip."""
    n, c, d, h, w = x.shape
    x = jnp.broadcast_to(x[:, :, :, None, :, None, :, None],
                         (n, c, d, factor, h, factor, w, factor))
    return x.reshape(n, c, d * factor, h * factor, w * factor)


def _choose_tile_d(d, hw, cin, itemsize):
    """Depth tile: sublane-aligned divisor of D, sized for pipelining & v7x VMEM headroom."""
    if hw % 128 != 0:                 # lane-dense fast path unavailable -> full-volume block
        return d
    sub = 8 if itemsize >= 4 else 16  # f32 vs bf16 sublane granularity for the block shape
    cands = [t for t in range(sub, d, sub) if d % t == 0]
    if not cands:
        return d
    budget = 4 << 20                  # ~4 MiB per x block; 2 buffers stay tiny vs 64 MiB VMEM
    good = [t for t in cands if cin * t * hw * itemsize <= budget]
    return max(good) if good else min(cands)


def to_rgb(x, w, bias, skip=None, res_factor=2):
    """ToRGB.forward: 1x1x1 conv (Cout=1, weight scale 1/sqrt(Cin)) + bias [+ blur(upscale(skip))]."""
    n, cin, d, h, wd = x.shape
    hw = h * wd
    scale = 1.0 / math.sqrt(cin)                         # kernel_size=1 -> 1/sqrt(cin*1^3)
    w_s = jnp.reshape(w, (-1,)).astype(jnp.float32) * scale
    b = jnp.reshape(bias, (-1,))[:1].astype(jnp.float32)

    # Keep x in its wire dtype (bf16 stays bf16; promoted in-kernel) and make it lane-dense.
    x_flat = x.reshape(n, cin, d, hw)
    tile_d = _choose_tile_d(d, hw, cin, jnp.dtype(x.dtype).itemsize)
    n_dt = d // tile_d
    grid = (n, n_dt)

    smem = pl.BlockSpec(memory_space=pltpu.MemorySpace.SMEM)
    x_spec = pl.BlockSpec((1, cin, tile_d, hw), lambda i, j: (i, 0, j, 0))
    o_spec = pl.BlockSpec((1, 1, tile_d, hw), lambda i, j: (i, 0, j, 0))
    out_shape = jax.ShapeDtypeStruct((n, 1, d, hw), jnp.float32)
    cparams = pltpu.CompilerParams(
        dimension_semantics=("parallel", "parallel"),
        vmem_limit_bytes=48 * 1024 * 1024)

    x_bytes = x_flat.size * jnp.dtype(x_flat.dtype).itemsize
    out_bytes = 4 * n * d * hw

    if skip is None:
        cost = pl.CostEstimate(flops=2 * n * cin * d * hw, transcendentals=0,
                               bytes_accessed=x_bytes + out_bytes)
        out = pl.pallas_call(
            functools.partial(_torgb_conv_kernel, cin=cin),
            out_shape=out_shape, grid=grid,
            in_specs=[smem, smem, x_spec], out_specs=o_spec,
            compiler_params=cparams, cost_estimate=cost,
        )(w_s, b, x_flat)
        return out.reshape(n, 1, d, h, wd)

    # TODO(synk): fold upscale∘blur into an in-kernel polyphase filter ([1,6,1]/8 even phase,
    # [4,4]/8 odd phase per axis) reading the 8x-smaller low-res skip directly; needs
    # lane-interleaved stores, so the nearest-upscale + halo pad remain wrapper-side JAX glue.
    if res_factor == 2:
        skip = _upscale3d(skip)
    assert skip.shape == (n, 1, d, h, wd), skip.shape
    # (1,2) zero halo per spatial axis so the in-kernel blur uses pure static slices.
    skip_p = jnp.pad(skip, ((0, 0), (0, 0), (1, 2), (1, 2), (1, 2)))
    # Full padded skip stays resident in VMEM per sample (index map constant along the D-tile
    # axis); it is single-channel, so its footprint/traffic is ~1/cin of x.
    skip_spec = pl.BlockSpec((1, 1, d + 3, h + 3, wd + 3), lambda i, j: (i, 0, 0, 0, 0))

    cost = pl.CostEstimate(
        flops=2 * n * cin * d * hw + 3 * 8 * n * d * hw, transcendentals=0,
        bytes_accessed=x_bytes + skip_p.size * jnp.dtype(skip_p.dtype).itemsize + out_bytes)
    out = pl.pallas_call(
        functools.partial(_torgb_conv_blur_kernel, cin=cin, tile_d=tile_d, h=h, w=wd),
        out_shape=out_shape, grid=grid,
        in_specs=[smem, smem, x_spec, skip_spec], out_specs=o_spec,
        compiler_params=cparams, cost_estimate=cost,
    )(w_s, b, x_flat, skip_p)
    return out.reshape(n, 1, d, h, wd)


# --------------------------------------------------------------------------- pure-JAX reference
def _to_rgb_ref(x, w, bias, skip=None, res_factor=2):
    cin = x.shape[1]
    scale = 1.0 / math.sqrt(cin)
    out = jnp.einsum("ncdhw,c->ndhw", x, jnp.reshape(w, (-1,)) * scale)[:, None] + bias[0]
    if skip is not None:
        if res_factor == 2:
            skip = _upscale3d(skip)
        k1 = jnp.array([1.0, 3.0, 3.0, 1.0], jnp.float32)
        kern = k1[:, None, None] * k1[None, :, None] * k1[None, None, :]
        kern = (kern / kern.sum()).reshape(1, 1, 4, 4, 4)
        blurred = jax.lax.conv_general_dilated(
            skip, kern, window_strides=(1, 1, 1),
            padding=((1, 2), (1, 2), (1, 2)),
            dimension_numbers=("NCDHW", "OIDHW", "NCDHW"))
        out = out + blurred
    return out


# --------------------------------------------------------------------------- main
if __name__ == "__main__":
    key = jax.random.PRNGKey(0)
    kw, kb, kx, ks = jax.random.split(key, 4)

    N, CIN, S = 2, 8, 16                                    # full-res spatial 16^3, skip at 8^3
    w = jax.random.normal(kw, (CIN,), dtype=jnp.float32)    # torch weight (1,1,CIN,1,1,1) flattened
    bias = 0.1 * jax.random.normal(kb, (1,), dtype=jnp.float32)
    x = jax.random.normal(kx, (N, CIN, S, S, S), dtype=jnp.float32)
    skip = jax.random.normal(ks, (N, 1, S // 2, S // 2, S // 2), dtype=jnp.float32)

    # main path: res_factor=2, skip provided (upscale + blur + add)
    f2 = jax.jit(functools.partial(to_rgb, res_factor=2))
    out = jax.block_until_ready(f2(x, w, bias, skip))
    ref = _to_rgb_ref(x, w, bias, skip, res_factor=2)
    assert out.shape == (N, 1, S, S, S), out.shape
    assert bool(jnp.allclose(out, ref, atol=1e-4, rtol=1e-4)), float(jnp.max(jnp.abs(out - ref)))

    # first-ToRGB path: no skip
    out0 = jax.block_until_ready(jax.jit(to_rgb)(x, w, bias, None))
    ref0 = _to_rgb_ref(x, w, bias, None)
    assert bool(jnp.allclose(out0, ref0, atol=1e-4, rtol=1e-4))

    # final-ToRGB path: res_factor=1, skip already at full resolution
    skip_full = jax.random.normal(ks, (N, 1, S, S, S), dtype=jnp.float32)
    f1 = jax.jit(functools.partial(to_rgb, res_factor=1))
    out1 = jax.block_until_ready(f1(x, w, bias, skip_full))
    ref1 = _to_rgb_ref(x, w, bias, skip_full, res_factor=1)
    assert bool(jnp.allclose(out1, ref1, atol=1e-4, rtol=1e-4))

    # bf16-on-the-wire + larger Cin (exercises the fori_loop channel path with a ragged tail)
    CIN_BIG = 42
    wb = jax.random.normal(kw, (CIN_BIG,), dtype=jnp.float32)
    xb = jax.random.normal(kx, (N, CIN_BIG, S, S, S), dtype=jnp.float32).astype(jnp.bfloat16)
    outb = jax.block_until_ready(jax.jit(to_rgb)(xb, wb, bias, None))
    refb = _to_rgb_ref(xb.astype(jnp.float32), wb, bias, None)
    assert bool(jnp.allclose(outb, refb, atol=1e-3, rtol=1e-3)), float(jnp.max(jnp.abs(outb - refb)))

    assert bool(jnp.all(jnp.isfinite(out)))
    print("KERNEL_OK")
</pallas_src>

<mosaic_0001>
module attributes {stable_mosaic.version = 11 : i64} {
  func.func @_torgb_conv_blur_kernel(%arg0: i32, %arg1: i32, %arg2: memref<8xf32, #tpu.memory_space<smem>>, %arg3: memref<1xf32, #tpu.memory_space<smem>>, %arg4: memref<1x8x8x256xf32, #tpu.memory_space<vmem>>, %arg5: memref<1x1x19x19x19xf32, #tpu.memory_space<vmem>>, %arg6: memref<1x1x8x256xf32, #tpu.memory_space<vmem>>) attributes {dimension_semantics = [#tpu.dimension_semantics<parallel>, #tpu.dimension_semantics<parallel>], iteration_bounds = array<i64: 2, 2>, scalar_prefetch = 0 : i64, scratch_operands = 0 : i64, tpu.core_type = #tpu.core_type<tc>, window_params = [{transform_indices = @transform_0, window_bounds = array<i64: 8>}, {transform_indices = @transform_1, window_bounds = array<i64: 1>}, {transform_indices = @transform_2, window_bounds = array<i64: 1, 8, 8, 256>}, {transform_indices = @transform_3, window_bounds = array<i64: 1, 1, 19, 19, 19>}, {transform_indices = @transform_4, window_bounds = array<i64: 1, 1, 8, 256>}]} {
    %c0 = arith.constant 0 : index
    %c0_0 = arith.constant 0 : index
    %c0_1 = arith.constant 0 : index
    %c0_2 = arith.constant 0 : index
    %0 = vector.load %arg4[%c0, %c0_0, %c0_1, %c0_2] : memref<1x8x8x256xf32, #tpu.memory_space<vmem>>, vector<1x1x8x256xf32>
    %1 = vector.shape_cast %0 : vector<1x1x8x256xf32> to vector<8x256xf32>
    %c0_3 = arith.constant 0 : index
    %2 = memref.load %arg2[%c0_3] : memref<8xf32, #tpu.memory_space<smem>>
    %3 = vector.broadcast %2 : f32 to vector<8x256xf32>
    %4 = arith.mulf %1, %3 : vector<8x256xf32>
    %c0_4 = arith.constant 0 : index
    %c1 = arith.constant 1 : index
    %c0_5 = arith.constant 0 : index
    %c0_6 = arith.constant 0 : index
    %5 = vector.load %arg4[%c0_4, %c1, %c0_5, %c0_6] : memref<1x8x8x256xf32, #tpu.memory_space<vmem>>, vector<1x1x8x256xf32>
    %6 = vector.shape_cast %5 : vector<1x1x8x256xf32> to vector<8x256xf32>
    %c1_7 = arith.constant 1 : index
    %7 = memref.load %arg2[%c1_7] : memref<8xf32, #tpu.memory_space<smem>>
    %8 = vector.broadcast %7 : f32 to vector<8x256xf32>
    %9 = arith.mulf %6, %8 : vector<8x256xf32>
    %c0_8 = arith.constant 0 : index
    %c2 = arith.constant 2 : index
    %c0_9 = arith.constant 0 : index
    %c0_10 = arith.constant 0 : index
    %10 = vector.load %arg4[%c0_8, %c2, %c0_9, %c0_10] : memref<1x8x8x256xf32, #tpu.memory_space<vmem>>, vector<1x1x8x256xf32>
    %11 = vector.shape_cast %10 : vector<1x1x8x256xf32> to vector<8x256xf32>
    %c2_11 = arith.constant 2 : index
    %12 = memref.load %arg2[%c2_11] : memref<8xf32, #tpu.memory_space<smem>>
    %13 = vector.broadcast %12 : f32 to vector<8x256xf32>
    %14 = arith.mulf %11, %13 : vector<8x256xf32>
    %c0_12 = arith.constant 0 : index
    %c3 = arith.constant 3 : index
    %c0_13 = arith.constant 0 : index
    %c0_14 = arith.constant 0 : index
    %15 = vector.load %arg4[%c0_12, %c3, %c0_13, %c0_14] : memref<1x8x8x256xf32, #tpu.memory_space<vmem>>, vector<1x1x8x256xf32>
    %16 = vector.shape_cast %15 : vector<1x1x8x256xf32> to vector<8x256xf32>
    %c3_15 = arith.constant 3 : index
    %17 = memref.load %arg2[%c3_15] : memref<8xf32, #tpu.memory_space<smem>>
    %18 = vector.broadcast %17 : f32 to vector<8x256xf32>
    %19 = arith.mulf %16, %18 : vector<8x256xf32>
    %c0_16 = arith.constant 0 : index
    %c4 = arith.constant 4 : index
    %c0_17 = arith.constant 0 : index
    %c0_18 = arith.constant 0 : index
    %20 = vector.load %arg4[%c0_16, %c4, %c0_17, %c0_18] : memref<1x8x8x256xf32, #tpu.memory_space<vmem>>, vector<1x1x8x256xf32>
    %21 = vector.shape_cast %20 : vector<1x1x8x256xf32> to vector<8x256xf32>
    %c4_19 = arith.constant 4 : index
    %22 = memref.load %arg2[%c4_19] : memref<8xf32, #tpu.memory_space<smem>>
    %23 = vector.broadcast %22 : f32 to vector<8x256xf32>
    %24 = arith.mulf %21, %23 : vector<8x256xf32>
    %25 = arith.addf %4, %24 : vector<8x256xf32>
    %c0_20 = arith.constant 0 : index
    %c5 = arith.constant 5 : index
    %c0_21 = arith.constant 0 : index
    %c0_22 = arith.constant 0 : index
    %26 = vector.load %arg4[%c0_20, %c5, %c0_21, %c0_22] : memref<1x8x8x256xf32, #tpu.memory_space<vmem>>, vector<1x1x8x256xf32>
    %27 = vector.shape_cast %26 : vector<1x1x8x256xf32> to vector<8x256xf32>
    %c5_23 = arith.constant 5 : index
    %28 = memref.load %arg2[%c5_23] : memref<8xf32, #tpu.memory_space<smem>>
    %29 = vector.broadcast %28 : f32 to vector<8x256xf32>
    %30 = arith.mulf %27, %29 : vector<8x256xf32>
    %31 = arith.addf %9, %30 : vector<8x256xf32>
    %c0_24 = arith.constant 0 : index
    %c6 = arith.constant 6 : index
    %c0_25 = arith.constant 0 : index
    %c0_26 = arith.constant 0 : index
    %32 = vector.load %arg4[%c0_24, %c6, %c0_25, %c0_26] : memref<1x8x8x256xf32, #tpu.memory_space<vmem>>, vector<1x1x8x256xf32>
    %33 = vector.shape_cast %32 : vector<1x1x8x256xf32> to vector<8x256xf32>
    %c6_27 = arith.constant 6 : index
    %34 = memref.load %arg2[%c6_27] : memref<8xf32, #tpu.memory_space<smem>>
    %35 = vector.broadcast %34 : f32 to vector<8x256xf32>
    %36 = arith.mulf %33, %35 : vector<8x256xf32>
    %37 = arith.addf %14, %36 : vector<8x256xf32>
    %c0_28 = arith.constant 0 : index
    %c7 = arith.constant 7 : index
    %c0_29 = arith.constant 0 : index
    %c0_30 = arith.constant 0 : index
    %38 = vector.load %arg4[%c0_28, %c7, %c0_29, %c0_30] : memref<1x8x8x256xf32, #tpu.memory_space<vmem>>, vector<1x1x8x256xf32>
    %39 = vector.shape_cast %38 : vector<1x1x8x256xf32> to vector<8x256xf32>
    %c7_31 = arith.constant 7 : index
    %40 = memref.load %arg2[%c7_31] : memref<8xf32, #tpu.memory_space<smem>>
    %41 = vector.broadcast %40 : f32 to vector<8x256xf32>
    %42 = arith.mulf %39, %41 : vector<8x256xf32>
    %43 = arith.addf %19, %42 : vector<8x256xf32>
    %44 = arith.addf %25, %31 : vector<8x256xf32>
    %45 = arith.addf %37, %43 : vector<8x256xf32>
    %46 = arith.addf %44, %45 : vector<8x256xf32>
    %c0_32 = arith.constant 0 : index
    %47 = memref.load %arg3[%c0_32] : memref<1xf32, #tpu.memory_space<smem>>
    %48 = vector.broadcast %47 : f32 to vector<8x256xf32>
    %49 = arith.addf %46, %48 : vector<8x256xf32>
    %c8_i32 = arith.constant 8 : i32
    %50 = arith.muli %arg1, %c8_i32 : i32
    %c0_33 = arith.constant 0 : index
    %c0_34 = arith.constant 0 : index
    %51 = arith.index_cast %50 : i32 to index
    %c0_35 = arith.constant 0 : index
    %c0_36 = arith.constant 0 : index
    %52 = vector.load %arg5[%c0_33, %c0_34, %51, %c0_35, %c0_36] : memref<1x1x19x19x19xf32, #tpu.memory_space<vmem>>, vector<1x1x11x19x19xf32>
    %53 = vector.shape_cast %52 : vector<1x1x11x19x19xf32> to vector<11x19x19xf32>
    %54 = vector.extract_strided_slice %53 {offsets = [0, 0, 0], sizes = [11, 19, 16], strides = [1, 1, 1]} : vector<11x19x19xf32> to vector<11x19x16xf32>
    %cst = arith.constant 1.250000e-01 : f32
    %55 = vector.broadcast %cst : f32 to vector<11x19x16xf32>
    %56 = arith.mulf %55, %54 : vector<11x19x16xf32>
    %57 = vector.extract_strided_slice %53 {offsets = [0, 0, 1], sizes = [11, 19, 16], strides = [1, 1, 1]} : vector<11x19x19xf32> to vector<11x19x16xf32>
    %cst_37 = arith.constant 3.750000e-01 : f32
    %58 = vector.broadcast %cst_37 : f32 to vector<11x19x16xf32>
    %59 = arith.mulf %58, %57 : vector<11x19x16xf32>
    %60 = arith.addf %56, %59 : vector<11x19x16xf32>
    %61 = vector.extract_strided_slice %53 {offsets = [0, 0, 2], sizes = [11, 19, 16], strides = [1, 1, 1]} : vector<11x19x19xf32> to vector<11x19x16xf32>
    %cst_38 = arith.constant 3.750000e-01 : f32
    %62 = vector.broadcast %cst_38 : f32 to vector<11x19x16xf32>
    %63 = arith.mulf %62, %61 : vector<11x19x16xf32>
    %64 = arith.addf %60, %63 : vector<11x19x16xf32>
    %65 = vector.extract_strided_slice %53 {offsets = [0, 0, 3], sizes = [11, 19, 16], strides = [1, 1, 1]} : vector<11x19x19xf32> to vector<11x19x16xf32>
    %cst_39 = arith.constant 1.250000e-01 : f32
    %66 = vector.broadcast %cst_39 : f32 to vector<11x19x16xf32>
    %67 = arith.mulf %66, %65 : vector<11x19x16xf32>
    %68 = arith.addf %64, %67 : vector<11x19x16xf32>
    %69 = vector.extract_strided_slice %68 {offsets = [0, 0, 0], sizes = [11, 16, 16], strides = [1, 1, 1]} : vector<11x19x16xf32> to vector<11x16x16xf32>
    %cst_40 = arith.constant 1.250000e-01 : f32
    %70 = vector.broadcast %cst_40 : f32 to vector<11x16x16xf32>
    %71 = arith.mulf %70, %69 : vector<11x16x16xf32>
    %72 = vector.extract_strided_slice %68 {offsets = [0, 1, 0], sizes = [11, 16, 16], strides = [1, 1, 1]} : vector<11x19x16xf32> to vector<11x16x16xf32>
    %cst_41 = arith.constant 3.750000e-01 : f32
    %73 = vector.broadcast %cst_41 : f32 to vector<11x16x16xf32>
    %74 = arith.mulf %73, %72 : vector<11x16x16xf32>
    %75 = arith.addf %71, %74 : vector<11x16x16xf32>
    %76 = vector.extract_strided_slice %68 {offsets = [0, 2, 0], sizes = [11, 16, 16], strides = [1, 1, 1]} : vector<11x19x16xf32> to vector<11x16x16xf32>
    %cst_42 = arith.constant 3.750000e-01 : f32
    %77 = vector.broadcast %cst_42 : f32 to vector<11x16x16xf32>
    %78 = arith.mulf %77, %76 : vector<11x16x16xf32>
    %79 = arith.addf %75, %78 : vector<11x16x16xf32>
    %80 = vector.extract_strided_slice %68 {offsets = [0, 3, 0], sizes = [11, 16, 16], strides = [1, 1, 1]} : vector<11x19x16xf32> to vector<11x16x16xf32>
    %cst_43 = arith.constant 1.250000e-01 : f32
    %81 = vector.broadcast %cst_43 : f32 to vector<11x16x16xf32>
    %82 = arith.mulf %81, %80 : vector<11x16x16xf32>
    %83 = arith.addf %79, %82 : vector<11x16x16xf32>
    %84 = vector.extract_strided_slice %83 {offsets = [0, 0, 0], sizes = [8, 16, 16], strides = [1, 1, 1]} : vector<11x16x16xf32> to vector<8x16x16xf32>
    %cst_44 = arith.constant 1.250000e-01 : f32
    %85 = vector.broadcast %cst_44 : f32 to vector<8x16x16xf32>
    %86 = arith.mulf %85, %84 : vector<8x16x16xf32>
    %87 = vector.extract_strided_slice %83 {offsets = [1, 0, 0], sizes = [8, 16, 16], strides = [1, 1, 1]} : vector<11x16x16xf32> to vector<8x16x16xf32>
    %cst_45 = arith.constant 3.750000e-01 : f32
    %88 = vector.broadcast %cst_45 : f32 to vector<8x16x16xf32>
    %89 = arith.mulf %88, %87 : vector<8x16x16xf32>
    %90 = arith.addf %86, %89 : vector<8x16x16xf32>
    %91 = vector.extract_strided_slice %83 {offsets = [2, 0, 0], sizes = [8, 16, 16], strides = [1, 1, 1]} : vector<11x16x16xf32> to vector<8x16x16xf32>
    %cst_46 = arith.constant 3.750000e-01 : f32
    %92 = vector.broadcast %cst_46 : f32 to vector<8x16x16xf32>
    %93 = arith.mulf %92, %91 : vector<8x16x16xf32>
    %94 = arith.addf %90, %93 : vector<8x16x16xf32>
    %95 = vector.extract_strided_slice %83 {offsets = [3, 0, 0], sizes = [8, 16, 16], strides = [1, 1, 1]} : vector<11x16x16xf32> to vector<8x16x16xf32>
    %cst_47 = arith.constant 1.250000e-01 : f32
    %96 = vector.broadcast %cst_47 : f32 to vector<8x16x16xf32>
    %97 = arith.mulf %96, %95 : vector<8x16x16xf32>
    %98 = arith.addf %94, %97 : vector<8x16x16xf32>
    %99 = vector.shape_cast %98 : vector<8x16x16xf32> to vector<8x256xf32>
    %100 = arith.addf %49, %99 : vector<8x256xf32>
    %c0_48 = arith.constant 0 : index
    %c0_49 = arith.constant 0 : index
    %c0_50 = arith.constant 0 : index
    %c0_51 = arith.constant 0 : index
    %101 = vector.load %arg6[%c0_48, %c0_49, %c0_50, %c0_51] : memref<1x1x8x256xf32, #tpu.memory_space<vmem>>, vector<1x1x8x256xf32>
    %102 = vector.shape_cast %101 : vector<1x1x8x256xf32> to vector<8x256xf32>
    %103 = vector.shape_cast %100 : vector<8x256xf32> to vector<1x1x8x256xf32>
    tpu.vector_store %arg6[%c0_48, %c0_49, %c0_50, %c0_51], %103 {strides = array<i32>} : memref<1x1x8x256xf32, #tpu.memory_space<vmem>>, vector<1x1x8x256xf32>,
    return
  }
  func.func @transform_0(%arg0: i32, %arg1: i32) -> i32 {
    %c0_i32 = arith.constant 0 : i32
    %c0_i32_0 = arith.constant 0 : i32
    return %c0_i32 : i32
  }
  func.func @transform_1(%arg0: i32, %arg1: i32) -> i32 {
    %c0_i32 = arith.constant 0 : i32
    %c0_i32_0 = arith.constant 0 : i32
    return %c0_i32 : i32
  }
  func.func @transform_2(%arg0: i32, %arg1: i32) -> (i32, i32, i32, i32) {
    %c0_i32 = arith.constant 0 : i32
    %c0_i32_0 = arith.constant 0 : i32
    %c0_i32_1 = arith.constant 0 : i32
    return %arg0, %c0_i32, %arg1, %c0_i32_0 : i32, i32, i32, i32
  }
  func.func @transform_3(%arg0: i32, %arg1: i32) -> (i32, i32, i32, i32, i32) {
    %c0_i32 = arith.constant 0 : i32
    %c0_i32_0 = arith.constant 0 : i32
    %c0_i32_1 = arith.constant 0 : i32
    %c0_i32_2 = arith.constant 0 : i32
    %c0_i32_3 = arith.constant 0 : i32
    return %arg0, %c0_i32, %c0_i32_0, %c0_i32_1, %c0_i32_2 : i32, i32, i32, i32, i32
  }
  func.func @transform_4(%arg0: i32, %arg1: i32) -> (i32, i32, i32, i32) {
    %c0_i32 = arith.constant 0 : i32
    %c0_i32_0 = arith.constant 0 : i32
    %c0_i32_1 = arith.constant 0 : i32
    return %arg0, %c0_i32, %arg1, %c0_i32_0 : i32, i32, i32, i32
  }
}

</mosaic_0001>

<bundles_post_ra>
// kernel: to_rgb.1
= control target key start
LH: loop header
LB: loop body
LE: loop exit
PB: predicated region body
PF: predicated region fallthrough
CT: control target
= control target key end

     0   :  { %s3510_s0 = inlined_call_operand.vmem [shape: f32[8], index: 0, kind: input, shape index: {}]   ;;  %s3511_s1 = inlined_call_operand.<no memory space> [shape: f32[1], index: 1, kind: input, shape index: {}]   ;;  %s3512_s2 = inlined_call_operand.vmem [shape: f32[2,8,16,256], index: 2, kind: input, shape index: {}]   ;;  %s3513_s3 = inlined_call_operand.vmem [shape: f32[2,1,19,19,19], index: 3, kind: input, shape index: {}]   ;;  %s3514_s4 = inlined_call_operand.vmem [shape: f32[2,1,16,256], index: 4, kind: output, shape index: {}]  }
   0x1   :  { %9 = sst [smem:[#allocation2]] %s3511_s1 }
   0x2   :  { %10 = vsyncpa [#allocation4], 0  ;;  %s2131_s17 = smov 0   ;;  %s2133_s18 = smov 0  }
   0x3   :  { %s2135_s19 = smov 0   ;;  %s2137_s20 = smov 0  }
   0x4   :  { %s2139_s21 = smov 0   ;;  %s2141_s22 = smov 0  }
   0x5   :  { %s2143_s23 = smov 0  }
   0x6 LB: > { %s1894_s1 = sadd.s32 4294967295, %s2088_s23   ;;  %s25_s24 = sadd.s32 1, %s2080_s21  ;;  %s2088_s23 = sphi %s2143_s23, %s16_s23   ;;  %s2084_s22 = sphi %s2141_s22, %s3562_s22   ;;  %s2080_s21 = sphi %s2139_s21, %s3561_s21   ;;  %s2076_s20 = sphi %s2137_s20, %s3560_s20   ;;  %s2072_s19 = sphi %s2135_s19, %s3559_s19   ;;  %s2068_s18 = sphi %s2133_s18, %s3558_s18   ;;  %s2064_s17 = sphi %s2131_s17, %s3557_s17  }
   0x7   : > { %p26_p0 = scmp.ge.s32.totalorder %s25_s24, 2  ;;  %s28_s25 = sadd.s32 1, %s2084_s22 }
   0x8   : > { %s79_s26 = sadd.s32 1, %s2068_s18  ;;  %p86_p1 = scmp.ne.s32.totalorder %s2068_s18, %s2064_s17 }
   0x9   : > { %s3564_s24 = smov (%p26_p0, %s25_s24), 0  ;;  %s3566_s25 = smov (!%p26_p0, %s28_s25), %s2084_s22 }
   0xa   : > { %s75_s27 = ssub.s32 %s2080_s21, %s3564_s24  ;;  %p87_p2 = scmp.eq.s32.totalorder %s2088_s23, 0 }
   0xb   : > { %p30_p3 = scmp.ge.s32.totalorder %s3566_s25, 2  ;;  %p1896_p4 = scmp.ge.s32.totalorder %s2088_s23, 1 }
   0xc   : > { %p2179_p5 = por %p87_p2, %p86_p1  ;;  %p157_p6 = scmp.lt.s32.totalorder %s2088_s23, 5 }
   0xd   : > { %s3568_s25 = smov (%p30_p3, %s3566_s25), 0  ;;  %p2192_p8 = scmp.eq.s32.totalorder %s1894_s1, 0 }
   0xe   : > { %p2186_p7 = pnand %p1896_p4, %p157_p6  ;;  %s74_s30 = ssub.s32 %s2084_s22, %s3568_s25 }
   0xf   : > { %s76_s6 = sor.u32 %s75_s27, %s74_s30  ;;  %s169_s9 = sshll.u32 %s3510_s0, 4  ;;  %s170_s9 = int_to_ptr.vmem [resolvable:$true] %s169_s9 }
  0x10   : > { %p1940_p9 = pneg %p2186_p7  ;;  %p77_p10 = scmp.eq.s32.totalorder %s76_s6, 0 }
  0x11   : > { %s2090_s11 = smov [#allocation3]   ;;  %p1898_p12 = scmp.ge.s32.totalorder %s2088_s23, 4 }
  0x12   : > { %p1941_p11 = pnand %p2192_p8, %p1940_p9 }
  0x13   : > { %s2204_s10 = scalar_select %p77_p10, %s2068_s18, %s79_s26  }
  0x14   : > { %1943 = dma.vmem_to_smem (!%p1941_p11), %s170_s9, 16, %s2090_s11, [#allocation4]  }
  0x15   : > { %179 = sbr.rel (%p1898_p12) target bundleno = 49 (0x31), region = 24 }
  0x1a   : > { %182 = sbr.rel (!%p2179_p5) target bundleno = 49 (0x31), region = 28  ;;  %s184_s12 = sand.u32 (%p2179_p5), 1, %s2068_s18  }
  0x1b   : > { %s1900_s13 = sshll.u32 (%p2179_p5), %s2080_s21, 1  ;;  %s1899_s14 = sshll.u32 (%p2179_p5), %s184_s12, 7 }
  0x1c   : > { %s1901_s15 = sshll.u32 (%p2179_p5), %s2084_s22, 5  ;;  %s186_s28 = scalar_lea.vmem (%p2179_p5), [#allocation5], %s1899_s14 }
  0x1d   : > { %s189_s16 = sadd.s32 (%p2179_p5), %s1901_s15, %s1900_s13 }
  0x1e   : > { %s1902_s1 = sshll.u32 (%p2179_p5), %s189_s16, 3 }
  0x1f   : > { %s2215_s30 = scalar_lea.vmem %s3512_s2, %s1902_s1 }
  0x20   : > { %v204_v0 = vld [vmem:[%s2215_s30] sm:$0xff]  ;;  %v206_v1 = vld [vmem:[%s2215_s30 + $0x8] sm:$0xff] }
  0x21   : > { %v208_v2 = vld [vmem:[%s2215_s30 + $0x20] sm:$0xff]  ;;  %205 = vst [vmem:[%s186_s28] sm:$0xff] %v204_v0  ;;  %v210_v3 = vld [vmem:[%s2215_s30 + $0x28] sm:$0xff] }
  0x22   : > { %207 = vst [vmem:[%s186_s28 + $0x8] sm:$0xff] %v206_v1  ;;  %v212_v4 = vld [vmem:[%s2215_s30 + $0x40] sm:$0xff]  ;;  %v214_v5 = vld [vmem:[%s2215_s30 + $0x48] sm:$0xff] }
  0x23   : > { %209 = vst [vmem:[%s186_s28 + $0x10] sm:$0xff] %v208_v2  ;;  %v216_v6 = vld [vmem:[%s2215_s30 + $0x60] sm:$0xff]  ;;  %v218_v7 = vld [vmem:[%s2215_s30 + $0x68] sm:$0xff] }
  0x24   : > { %211 = vst [vmem:[%s186_s28 + $0x18] sm:$0xff] %v210_v3  ;;  %v220_v8 = vld [vmem:[%s2215_s30 + $0x80] sm:$0xff]  ;;  %v222_v9 = vld [vmem:[%s2215_s30 + $0x88] sm:$0xff] }
  0x25   : > { %213 = vst [vmem:[%s186_s28 + $0x20] sm:$0xff] %v212_v4  ;;  %v224_v10 = vld [vmem:[%s2215_s30 + $0xa0] sm:$0xff]  ;;  %v226_v11 = vld [vmem:[%s2215_s30 + $0xa8] sm:$0xff] }
  0x26   : > { %215 = vst [vmem:[%s186_s28 + $0x28] sm:$0xff] %v214_v5  ;;  %v228_v12 = vld [vmem:[%s2215_s30 + $0xc0] sm:$0xff]  ;;  %v230_v13 = vld [vmem:[%s2215_s30 + $0xc8] sm:$0xff] }
  0x27   : > { %217 = vst [vmem:[%s186_s28 + $0x30] sm:$0xff] %v216_v6  ;;  %v232_v14 = vld [vmem:[%s2215_s30 + $0xe0] sm:$0xff]  ;;  %v234_v15 = vld [vmem:[%s2215_s30 + $0xe8] sm:$0xff] }
  0x28   : > { %219 = vst [vmem:[%s186_s28 + $0x38] sm:$0xff] %v218_v7 }
  0x29   : > { %221 = vst [vmem:[%s186_s28 + $0x40] sm:$0xff] %v220_v8 }
  0x2a   : > { %223 = vst [vmem:[%s186_s28 + $0x48] sm:$0xff] %v222_v9 }
  0x2b   : > { %225 = vst [vmem:[%s186_s28 + $0x50] sm:$0xff] %v224_v10 }
  0x2c   : > { %227 = vst [vmem:[%s186_s28 + $0x58] sm:$0xff] %v226_v11 }
  0x2d   : > { %229 = vst [vmem:[%s186_s28 + $0x60] sm:$0xff] %v228_v12 }
  0x2e   : > { %231 = vst [vmem:[%s186_s28 + $0x68] sm:$0xff] %v230_v13 }
  0x2f   : > { %233 = vst [vmem:[%s186_s28 + $0x70] sm:$0xff] %v232_v14 }
  0x30   : > { %235 = vst [vmem:[%s186_s28 + $0x78] sm:$0xff] %v234_v15 }
  0x31 PF: > { %252 = sbr.rel (%p2186_p7) target bundleno = 636 (0x27c), region = 55 }
  0x36   : > { %2059 = dma.done.wait (%p2192_p8), [#allocation4], 16  }
  0x37   : > { %2061 = vsyncadd (%p2192_p8), [#allocation4], 4294967280  ;;  %s260_s6 = sand.u32 1, %s2064_s17  }
  0x38   : > { %s1905_s7 = sshll.u32 %s260_s6, 7 }
  0x39   : > { %s2240_s8 = scalar_lea.vmem [#allocation5], %s1905_s7 }
  0x3a   : > { %266 = sfence }
  0x3b   : > { %p295_p13 = scmp.lt.s32.totalorder %s2076_s20, 1  ;;  %s1932_s29 = smul.u32 192, %s2072_s19  ;;  %vm1034_vm0 = vcmask 1046528   ;;  %vm1134_vm1 = vcmask 1045504   ;;  %vm1278_vm2 = vcmask 1044480   ;;  %vm1467_vm3 = vcmask 1047556  }
  0x3c   : > { %s2091_s17 = smov 127   ;;  %s2092_s14 = smov 126   ;;  %vm1747_vm4 = vcmask 130048   ;;  %vm1749_vm5 = vcmask 261120   ;;  %vm1751_vm6 = vcmask 392192   ;;  %vm1753_vm7 = vcmask 523264  }
  0x3d   : > { %s3570_s20 = smov (!%p295_p13, %s2076_s20), 1  ;;  %s2093_s15 = smov 125   ;;  %vm1755_vm8 = vcmask 654336   ;;  %vm1757_vm9 = vcmask 785408   ;;  %vm1759_vm10 = vcmask 916480  }
  0x3e   : > { %s1935_s9 = smul.u32 456, %s3570_s20  ;;  %s2096_s16 = smov 16  }
  0x3f   : > { %s2097_s1 = smov 32   ;;  %s2098_s27 = smov 48  }
  0x40   : > { %s299_s5 = scalar_lea.vmem %s3513_s3, %s1935_s9  ;;  %s2099_s26 = smov 64  }
  0x41   : > { %s2251_s13 = scalar_lea.vmem %s299_s5, %s1932_s29  ;;  %s2100_s30 = smov 80  }
  0x42   : > { %v2254_v16 = vld [vmem:[%s2251_s13 + $0x20] sm:$0xff]  ;;  %v2257_v17 = vld [vmem:[%s2251_s13 + $0x10] sm:$0x7]  ;;  %v2278_v22 = vld [vmem:[%s2251_s13 + $0x28] sm:$0x7]  ;;  %s2101_s28 = smov 96  }
  0x43   : > { %v2260_v18 = vld [vmem:[%s2251_s13] sm:$0xff]  ;;  %v2263_v19 = vmul.f32 0.375, %v2254_v16  ;;  %v2266_v20 = vmul.f32 0.375, %v2257_v17  ;;  %v2281_v23 = vld [vmem:[%s2251_s13 + $0x18] sm:$0xff]  ;;  %v2284_v24 = vld [vmem:[%s2251_s13 + $0x8] sm:$0xff]  ;;  %v2287_v25 = vmul.f32 0.375, %v2278_v22 }
  0x44   : > { %v2269_v21 = vmul.f32 0.375, %v2260_v18  ;;  %v2290_v26 = vmul.f32 0.375, %v2281_v23  ;;  %v2293_v27 = vmul.f32 0.375, %v2284_v24  ;;  %v2302_v28 = vld [vmem:[%s2251_s13 + $0x40] sm:$0x7]  ;;  %v2305_v29 = vld [vmem:[%s2251_s13 + $0x38] sm:$0xff] }
  0x45   : > { %525 = vrot.lane.b32.xlu2 %v2263_v19, %s2091_s17  ;;  %521 = vrot.lane.b32.xlu1 %v2266_v20, %s2091_s17  ;;  %v2308_v30 = vld [vmem:[%s2251_s13 + $0x30] sm:$0xff]  ;;  %v2311_v31 = vmul.f32 0.375, %v2302_v28  ;;  %v2314_v32 = vmul.f32 0.375, %v2305_v29  ;;  %v2326_v34 = vld [vmem:[%s2251_s13 + $0x58] sm:$0x7]  ;;  %s2102_s6 = smov 112  }
  0x46   : > { %517 = vrot.lane.b32.xlu0 %v2269_v21, %s2091_s17  ;;  %v2317_v33 = vmul.f32 0.375, %v2308_v30  ;;  %v2329_v35 = vld [vmem:[%s2251_s13 + $0x50] sm:$0xff]  ;;  %v2332_v36 = vld [vmem:[%s2251_s13 + $0x48] sm:$0xff]  ;;  %v2335_v37 = vmul.f32 0.375, %v2326_v34  ;;  %v2356_v42 = vld [vmem:[%s2251_s13 + $0x60] sm:$0xff]  ;;  %s3426_s7 = sld [smem:[#allocation3]] }
  0x47   : > { %v2338_v38 = vmul.f32 0.375, %v2329_v35  ;;  %v2341_v39 = vmul.f32 0.375, %v2332_v36  ;;  %v2350_v40 = vld [vmem:[%s2251_s13 + $0x70] sm:$0x7]  ;;  %v2353_v41 = vld [vmem:[%s2251_s13 + $0x68] sm:$0xff]  ;;  %v2365_v45 = vmul.f32 0.375, %v2356_v42 }
  0x48   : > { %v2359_v43 = vmul.f32 0.375, %v2350_v40  ;;  %v2362_v44 = vmul.f32 0.375, %v2353_v41  ;;  %v2374_v46 = vld [vmem:[%s2251_s13 + $0x88] sm:$0x7]  ;;  %v2377_v47 = vld [vmem:[%s2251_s13 + $0x80] sm:$0xff]  ;;  %v2380_v48 = vld [vmem:[%s2251_s13 + $0x78] sm:$0xff] }
  0x49   : > { %3526 = vst [vmem:[#allocation7_spill] sm:$0xff] %v2380_v48  ;;  %v2383_v49 = vmul.f32 0.375, %v2374_v46  ;;  %v2386_v50 = vmul.f32 0.375, %v2377_v47  ;;  %v2389_v51 = vmul.f32 0.375, %v2380_v48  ;;  %v2398_v52 = vld [vmem:[%s2251_s13 + $0xa0] sm:$0x7] }
  0x4a   : > { %v2401_v53 = vld [vmem:[%s2251_s13 + $0x98] sm:$0xff]  ;;  %v2404_v54 = vld [vmem:[%s2251_s13 + $0x90] sm:$0xff]  ;;  %v2407_v55 = vmul.f32 0.375, %v2398_v52  ;;  %v2428_v60 = vld [vmem:[%s2251_s13 + $0xa8] sm:$0xff]  ;;  %s3428_s29 = sld [smem:[#allocation3 + $0x1]]  ;;  %p302_p0 = scmp.lt.s32.totalorder %s2072_s19, 1 }
  0x4b   : > { %v2410_v56 = vmul.f32 0.375, %v2401_v53  ;;  %v2413_v57 = vmul.f32 0.375, %v2404_v54  ;;  %v2422_v58 = vld [vmem:[%s2251_s13 + $0xb8] sm:$0x7]  ;;  %v2425_v59 = vld [vmem:[%s2251_s13 + $0xb0] sm:$0xff]  ;;  %v2437_v63 = vmul.f32 0.375, %v2428_v60 }
  0x4c   : > { %v2431_v61 = vmul.f32 0.375, %v2422_v58  ;;  %v2434_v62 = vmul.f32 0.375, %v2425_v59  ;;  %v2446_v0 = vld [vmem:[%s2251_s13 + $0xd0] sm:$0x7]  ;;  %v2449_v1 = vld [vmem:[%s2251_s13 + $0xc8] sm:$0xff]  ;;  %v2452_v2 = vld [vmem:[%s2251_s13 + $0xc0] sm:$0xff] }
  0x4d   : > { %527 = vrot.lane.b32.xlu2 %v2287_v25, %s2091_s17  ;;  %523 = vrot.lane.b32.xlu1 %v2290_v26, %s2091_s17  ;;  %3527 = vst [vmem:[#allocation8_spill] sm:$0xff] %v2446_v0  ;;  %v2455_v3 = vmul.f32 0.375, %v2446_v0  ;;  %v2458_v4 = vmul.f32 0.375, %v2449_v1  ;;  %v2461_v5 = vmul.f32 0.375, %v2452_v2  ;;  %v2470_v6 = vld [vmem:[%s2251_s13 + $0xe8] sm:$0x7] }
  0x4e   : > { %519 = vrot.lane.b32.xlu0 %v2293_v27, %s2091_s17  ;;  %3528 = vst [vmem:[#allocation9_spill] sm:$0xff] %v2470_v6  ;;  %v2473_v7 = vld [vmem:[%s2251_s13 + $0xe0] sm:$0xff]  ;;  %v2476_v8 = vld [vmem:[%s2251_s13 + $0xd8] sm:$0xff]  ;;  %v2479_v9 = vmul.f32 0.375, %v2470_v6  ;;  %v2500_v14 = vld [vmem:[%s2251_s13 + $0xf0] sm:$0xff]  ;;  %s3430_s9 = sld [smem:[#allocation3 + $0x2]] }
  0x4f   : > { %v2482_v10 = vmul.f32 0.375, %v2473_v7  ;;  %v2485_v11 = vmul.f32 0.375, %v2476_v8  ;;  %v2494_v12 = vld [vmem:[%s2251_s13 + $0x100] sm:$0x7]  ;;  %v2497_v13 = vld [vmem:[%s2251_s13 + $0xf8] sm:$0xff]  ;;  %v2509_v0 = vmul.f32 0.375, %v2500_v14 }
  0x50   : > { %3529 = vst [vmem:[#allocation10_spill] sm:$0xff] %v2494_v12  ;;  %v2503_v15 = vmul.f32 0.375, %v2494_v12  ;;  %v2506_v6 = vmul.f32 0.375, %v2497_v13  ;;  %s3432_s11 = sld [smem:[#allocation3 + $0x3]]  ;;  %s3572_s19 = smov (!%p302_p0, %s2072_s19), 1 }
  0x51   : > { %s3434_s12 = sld [smem:[#allocation3 + $0x4]] }
  0x52   : > { %s3438_s5 = sld [smem:[#allocation3 + $0x5]] }
  0x53   : > { %s3444_s13 = sld [smem:[#allocation3 + $0x6]] }
  0x55   : > { %533 = vrot.lane.b32.xlu2 %v2311_v31, %s2091_s17  ;;  %531 = vrot.lane.b32.xlu1 %v2314_v32, %s2091_s17 }
  0x56   : > { %529 = vrot.lane.b32.xlu0 %v2317_v33, %s2091_s17 }
  0x5d   : > { %539 = vrot.lane.b32.xlu2 %v2335_v37, %s2091_s17  ;;  %537 = vrot.lane.b32.xlu1 %v2338_v38, %s2091_s17 }
  0x5e   : > { %535 = vrot.lane.b32.xlu0 %v2341_v39, %s2091_s17 }
  0x65   : > { %545 = vrot.lane.b32.xlu2 %v2359_v43, %s2091_s17  ;;  %543 = vrot.lane.b32.xlu1 %v2362_v44, %s2091_s17 }
  0x66   : > { %541 = vrot.lane.b32.xlu0 %v2365_v45, %s2091_s17 }
  0x6d   : > { %551 = vrot.lane.b32.xlu2 %v2383_v49, %s2091_s17  ;;  %549 = vrot.lane.b32.xlu1 %v2386_v50, %s2091_s17 }
  0x6e   : > { %547 = vrot.lane.b32.xlu0 %v2389_v51, %s2091_s17 }
  0x75   : > { %557 = vrot.lane.b32.xlu2 %v2407_v55, %s2091_s17  ;;  %555 = vrot.lane.b32.xlu1 %v2410_v56, %s2091_s17 }
  0x76   : > { %553 = vrot.lane.b32.xlu0 %v2413_v57, %s2091_s17 }
  0x7d   : > { %563 = vrot.lane.b32.xlu2 %v2431_v61, %s2091_s17  ;;  %561 = vrot.lane.b32.xlu1 %v2434_v62, %s2091_s17 }
  0x7e   : > { %559 = vrot.lane.b32.xlu0 %v2437_v63, %s2091_s17 }
  0x85   : > { %569 = vrot.lane.b32.xlu2 %v2455_v3, %s2091_s17  ;;  %567 = vrot.lane.b32.xlu1 %v2458_v4, %s2091_s17 }
  0x86   : > { %565 = vrot.lane.b32.xlu0 %v2461_v5, %s2091_s17 }
  0x8d   : > { %575 = vrot.lane.b32.xlu2 %v2479_v9, %s2091_s17  ;;  %573 = vrot.lane.b32.xlu1 %v2482_v10, %s2091_s17 }
  0x8e   : > { %571 = vrot.lane.b32.xlu0 %v2485_v11, %s2091_s17 }
  0x95   : > { %581 = vrot.lane.b32.xlu2 %v2503_v15, %s2091_s17  ;;  %579 = vrot.lane.b32.xlu1 %v2506_v6, %s2091_s17 }
  0x96   : > { %577 = vrot.lane.b32.xlu0 %v2509_v0, %s2091_s17  ;;  %s3446_s17 = sld [smem:[#allocation3 + $0x7]] }
  0x9d   : > { %653 = vrot.lane.b32.xlu2 %v2266_v20, %s2092_s14  ;;  %651 = vrot.lane.b32.xlu1 %v2293_v27, %s2092_s14 }
  0x9e   : > { %649 = vrot.lane.b32.xlu0 %v2269_v21, %s2092_s14  ;;  %v2542_v21 = vmul.f32 0.125, %v2257_v17 }
  0x9f   : > { %v2523_v12 = vpop.permute.xlu2 %525 }
  0xa5   : > { %659 = vrot.lane.b32.xlu2 %v2287_v25, %s2092_s14  ;;  %657 = vrot.lane.b32.xlu1 %v2263_v19, %s2092_s14  ;;  %v2549_v19 = vmul.f32 0.125, %v2260_v18  ;;  %v2569_v18 = vmul.f32 0.125, %v2284_v24  ;;  %v2586_v24 = vmul.f32 0.125, %v2308_v30  ;;  %v2605_v30 = vmul.f32 0.125, %v2332_v36 }
  0xa6   : > { %655 = vrot.lane.b32.xlu0 %v2290_v26, %s2092_s14  ;;  %v2625_v36 = vmul.f32 0.125, %v2356_v42 }
  0xa7   : > { %v2531_v48 = vpop.permute.xlu2 %527 }
  0xad   : > { %665 = vrot.lane.b32.xlu2 %v2311_v31, %s2092_s14  ;;  %663 = vrot.lane.b32.xlu1 %v2314_v32, %s2092_s14  ;;  %v2562_v32 = vmul.f32 0.125, %v2281_v23 }
  0xae   : > { %661 = vrot.lane.b32.xlu0 %v2317_v33, %s2092_s14 }
  0xaf   : > { %v2539_v20 = vpop.permute.xlu2 %533 }
  0xb5   : > { %671 = vrot.lane.b32.xlu2 %v2335_v37, %s2092_s14  ;;  %669 = vrot.lane.b32.xlu1 %v2338_v38, %s2092_s14 }
  0xb6   : > { %667 = vrot.lane.b32.xlu0 %v2341_v39, %s2092_s14 }
  0xb7   : > { %v2553_v25 = vpop.permute.xlu2 %539  ;;  %v522_v26 = vpop.permute.xlu1 %521 }
  0xb8   : > { %v2556_v27 = vadd.f32 %v522_v26, %v2542_v21  ;;  %v518_v17 = vpop.permute.xlu0 %517 }
  0xb9   : > { %v2559_v31 = vadd.f32 %v518_v17, %v2549_v19  ;;  %v2598_v17 = vmul.f32 0.125, %v2329_v35 }
  0xbd   : > { %677 = vrot.lane.b32.xlu2 %v2359_v43, %s2092_s14  ;;  %675 = vrot.lane.b32.xlu1 %v2362_v44, %s2092_s14 }
  0xbe   : > { %673 = vrot.lane.b32.xlu0 %v2365_v45, %s2092_s14 }
  0xbf   : > { %v2573_v33 = vpop.permute.xlu2 %545  ;;  %v524_v37 = vpop.permute.xlu1 %523 }
  0xc0   : > { %v2576_v38 = vadd.f32 %v524_v37, %v2562_v32  ;;  %v520_v23 = vpop.permute.xlu0 %519 }
  0xc1   : > { %v2579_v39 = vadd.f32 %v520_v23, %v2569_v18 }
  0xc5   : > { %683 = vrot.lane.b32.xlu2 %v2383_v49, %s2092_s14  ;;  %681 = vrot.lane.b32.xlu1 %v2386_v50, %s2092_s14 }
  0xc6   : > { %679 = vrot.lane.b32.xlu0 %v2389_v51, %s2092_s14 }
  0xc7   : > { %v2590_v43 = vpop.permute.xlu2 %551  ;;  %v2592_v44 = vpop.permute.xlu1 %531 }
  0xc8   : > { %v530_v45 = vpop.permute.xlu0 %529 }
  0xc9   : > { %v2595_v26 = vadd.f32 %v530_v45, %v2586_v24 }
  0xcd   : > { %689 = vrot.lane.b32.xlu2 %v2407_v55, %s2092_s14  ;;  %687 = vrot.lane.b32.xlu1 %v2410_v56, %s2092_s14  ;;  %v2618_v55 = vmul.f32 0.125, %v2353_v41 }
  0xce   : > { %685 = vrot.lane.b32.xlu0 %v2413_v57, %s2092_s14 }
  0xcf   : > { %v2609_v49 = vpop.permute.xlu2 %557  ;;  %v538_v50 = vpop.permute.xlu1 %537 }
  0xd0   : > { %v2612_v51 = vadd.f32 %v538_v50, %v2598_v17  ;;  %v536_v35 = vpop.permute.xlu0 %535 }
  0xd1   : > { %v2615_v37 = vadd.f32 %v536_v35, %v2605_v30 }
  0xd5   : > { %695 = vrot.lane.b32.xlu2 %v2431_v61, %s2092_s14  ;;  %693 = vrot.lane.b32.xlu1 %v2434_v62, %s2092_s14 }
  0xd6   : > { %691 = vrot.lane.b32.xlu0 %v2437_v63, %s2092_s14  ;;  %v2650_v63 = vmul.f32 0.125, %v2401_v53 }
  0xd7   : > { %v2629_v56 = vpop.permute.xlu2 %563  ;;  %v544_v57 = vpop.permute.xlu1 %543 }
  0xd8   : > { %v2632_v23 = vadd.f32 %v544_v57, %v2618_v55  ;;  %v542_v41 = vpop.permute.xlu0 %541 }
  0xd9   : > { %v2635_v45 = vadd.f32 %v542_v41, %v2625_v36 }
  0xdd   : > { %701 = vrot.lane.b32.xlu2 %v2455_v3, %s2092_s14  ;;  %699 = vrot.lane.b32.xlu1 %v2458_v4, %s2092_s14  ;;  %v2657_v3 = vmul.f32 0.125, %v2404_v54  ;;  %v2677_v54 = vmul.f32 0.125, %v2428_v60  ;;  %v2697_v60 = vmul.f32 0.125, %v2452_v2  ;;  %v422_v2 = vmul.f32 0.125, %v2254_v16 }
  0xde   : > { %697 = vrot.lane.b32.xlu0 %v2461_v5, %s2092_s14 }
  0xdf   : > { %v2643_v42 = vpop.permute.xlu2 %569  ;;  %v2645_v61 = vpop.permute.xlu1 %549 }
  0xe0   : > { %v2647_v62 = vpop.permute.xlu0 %547 }
  0xe5   : > { %707 = vrot.lane.b32.xlu2 %v2479_v9, %s2092_s14  ;;  %705 = vrot.lane.b32.xlu1 %v2482_v10, %s2092_s14  ;;  %v2670_v9 = vmul.f32 0.125, %v2425_v59 }
  0xe6   : > { %703 = vrot.lane.b32.xlu0 %v2485_v11, %s2092_s14 }
  0xe7   : > { %v2661_v4 = vpop.permute.xlu2 %575  ;;  %v556_v5 = vpop.permute.xlu1 %555 }
  0xe8   : > { %v2664_v50 = vadd.f32 %v556_v5, %v2650_v63  ;;  %v554_v53 = vpop.permute.xlu0 %553 }
  0xe9   : > { %v2667_v35 = vadd.f32 %v554_v53, %v2657_v3 }
  0xed   : > { %713 = vrot.lane.b32.xlu2 %v2503_v15, %s2092_s14  ;;  %711 = vrot.lane.b32.xlu1 %v2506_v6, %s2092_s14  ;;  %v2690_v15 = vmul.f32 0.125, %v2449_v1 }
  0xee   : > { %709 = vrot.lane.b32.xlu0 %v2509_v0, %s2092_s14  ;;  %s1907_s14 = sshll.u32 %s3572_s19, 1 }
  0xef   : > { %v2681_v10 = vpop.permute.xlu2 %581  ;;  %v562_v11 = vpop.permute.xlu1 %561 }
  0xf0   : > { %v2684_v57 = vadd.f32 %v562_v11, %v2670_v9  ;;  %v560_v59 = vpop.permute.xlu0 %559  ;;  %v2713_v11 = vmul.f32 0.125, %v2473_v7 }
  0xf1   : > { %v2687_v41 = vadd.f32 %v560_v59, %v2677_v54 }
  0xf5   : > { %818 = vrot.lane.b32.xlu2 %v2542_v21, %s2093_s15  ;;  %816 = vrot.lane.b32.xlu1 %v2569_v18, %s2093_s15  ;;  %v423_v18 = vmul.f32 0.125, %v2278_v22 }
  0xf6   : > { %814 = vrot.lane.b32.xlu0 %v2549_v19, %s2093_s15  ;;  %v2718_v19 = vmul.f32 0.125, %v2476_v8  ;;  %v2733_v8 = vmul.f32 0.125, %v2497_v13 }
  0xf7   : > { %v654_v0 = vpop.permute.xlu2 %653  ;;  %v568_v6 = vpop.permute.xlu1 %567 }
  0xf8   : > { %v2702_v5 = vadd.f32 %v654_v0, %v2556_v27  ;;  %v2705_v1 = vadd.f32 %v568_v6, %v2690_v15  ;;  %v566_v53 = vpop.permute.xlu0 %565  ;;  %v621_v27 = vadd.f32 %v2531_v48, %v423_v18  ;;  %v2740_v48 = vmul.f32 0.125, %v2500_v14 }
  0xf9   : > { %v2708_v21 = vadd.f32 %v566_v53, %v2697_v60  ;;  %v426_v53 = vmul.f32 0.125, %v2302_v28 }
  0xfd   : > { %824 = vrot.lane.b32.xlu2 %v423_v18, %s2093_s15  ;;  %822 = vrot.lane.b32.xlu1 %v422_v2, %s2093_s15 }
  0xfe   : > { %820 = vrot.lane.b32.xlu0 %v2562_v32, %s2093_s15  ;;  %v624_v32 = vadd.f32 %v2539_v20, %v426_v53 }
  0xff   : > { %v660_v59 = vpop.permute.xlu2 %659  ;;  %v574_v0 = vpop.permute.xlu1 %573 }
 0x100   : > { %v2723_v22 = vadd.f32 %v660_v59, %v621_v27  ;;  %v2726_v16 = vadd.f32 %v574_v0, %v2713_v11  ;;  %v572_v7 = vpop.permute.xlu0 %571 }
 0x101   : > { %v2729_v6 = vadd.f32 %v572_v7, %v2718_v19 }
 0x105   : > { %834 = vrot.lane.b32.xlu2 %v2598_v17, %s2093_s15  ;;  %832 = vrot.lane.b32.xlu1 %v2605_v30, %s2093_s15  ;;  %v429_v30 = vmul.f32 0.125, %v2326_v34 }
 0x106   : > { %826 = vrot.lane.b32.xlu0 %v2586_v24, %s2093_s15 }
 0x107   : > { %v666_v18 = vpop.permute.xlu2 %665  ;;  %v580_v27 = vpop.permute.xlu1 %579  ;;  %v627_v14 = vadd.f32 %v2553_v25, %v429_v30  ;;  %v620_v25 = vadd.f32 %v2523_v12, %v422_v2  ;;  %v438_v12 = vmul.f32 0.125, %v2398_v52 }
 0x108   : > { %v2745_v28 = vadd.f32 %v666_v18, %v624_v32  ;;  %v2748_v13 = vadd.f32 %v580_v27, %v2733_v8  ;;  %v578_v59 = vpop.permute.xlu0 %577 }
 0x109   : > { %v2751_v17 = vadd.f32 %v578_v59, %v2740_v48 }
 0x10d   : > { %840 = vrot.lane.b32.xlu2 %v2618_v55, %s2093_s15  ;;  %838 = vrot.lane.b32.xlu1 %v2625_v36, %s2093_s15  ;;  %v432_v55 = vmul.f32 0.125, %v2350_v40 }
 0x10e   : > { %836 = vrot.lane.b32.xlu0 %v429_v30, %s2093_s15 }
 0x10f   : > { %v672_v20 = vpop.permute.xlu2 %671  ;;  %v652_v24 = vpop.permute.xlu1 %651  ;;  %v630_v36 = vadd.f32 %v2573_v33, %v432_v55 }
 0x110   : > { %v2760_v0 = vadd.f32 %v672_v20, %v627_v14  ;;  %v2763_v7 = vadd.f32 %v652_v24, %v2579_v39  ;;  %v650_v32 = vpop.permute.xlu0 %649 }
 0x111   : > { %v2766_v34 = vadd.f32 %v650_v32, %v2559_v31 }
 0x115   : > { %852 = vrot.lane.b32.xlu2 %v2650_v63, %s2093_s15  ;;  %850 = vrot.lane.b32.xlu1 %v2657_v3, %s2093_s15  ;;  %v435_v63 = vmul.f32 0.125, %v2374_v46  ;;  %v425_v3 = vmul.f32 0.125, %v2305_v29 }
 0x116   : > { %842 = vrot.lane.b32.xlu0 %v432_v55, %s2093_s15 }
 0x117   : > { %v678_v39 = vpop.permute.xlu2 %677  ;;  %v658_v18 = vpop.permute.xlu1 %657  ;;  %v633_v33 = vadd.f32 %v2590_v43, %v435_v63  ;;  %v623_v2 = vadd.f32 %v2592_v44, %v425_v3  ;;  %v636_v43 = vadd.f32 %v2609_v49, %v438_v12 }
 0x118   : > { %v2776_v27 = vadd.f32 %v678_v39, %v630_v36  ;;  %v2778_v31 = vadd.f32 %v658_v18, %v620_v25  ;;  %v656_v59 = vpop.permute.xlu0 %655  ;;  %v3531_v18 = vld [vmem:[#allocation8_spill] sm:$0xff] }
 0x119   : > { %v2781_v40 = vadd.f32 %v656_v59, %v2576_v38  ;;  %v444_v59 = vmul.f32 0.125, %v3531_v18 }
 0x11d   : > { %858 = vrot.lane.b32.xlu2 %v2670_v9, %s2093_s15  ;;  %856 = vrot.lane.b32.xlu1 %v2677_v54, %s2093_s15  ;;  %v441_v9 = vmul.f32 0.125, %v2422_v58  ;;  %v434_v58 = vmul.f32 0.125, %v2377_v47 }
 0x11e   : > { %854 = vrot.lane.b32.xlu0 %v438_v12, %s2093_s15 }
 0x11f   : > { %v684_v38 = vpop.permute.xlu2 %683  ;;  %v664_v30 = vpop.permute.xlu1 %663  ;;  %v639_v49 = vadd.f32 %v2629_v56, %v441_v9  ;;  %v642_v56 = vadd.f32 %v2643_v42, %v444_v59 }
 0x120   : > { %v2793_v14 = vadd.f32 %v684_v38, %v633_v33  ;;  %v2795_v46 = vadd.f32 %v664_v30, %v623_v2  ;;  %v662_v29 = vpop.permute.xlu0 %661  ;;  %v3532_v30 = vld [vmem:[#allocation9_spill] sm:$0xff] }
 0x121   : > { %v2798_v52 = vadd.f32 %v662_v29, %v2595_v26 }
 0x125   : > { %830 = vrot.lane.b32.xlu2 %v426_v53, %s2093_s15  ;;  %828 = vrot.lane.b32.xlu1 %v425_v3, %s2093_s15  ;;  %v3530_v53 = vld [vmem:[#allocation7_spill] sm:$0xff] }
 0x126   : > { %860 = vrot.lane.b32.xlu0 %v441_v9, %s2093_s15  ;;  %v433_v55 = vmul.f32 0.125, %v3530_v53 }
 0x127   : > { %v690_v44 = vpop.permute.xlu2 %689  ;;  %v670_v54 = vpop.permute.xlu1 %669 }
 0x128   : > { %v2805_v20 = vadd.f32 %v690_v44, %v636_v43  ;;  %v2808_v24 = vadd.f32 %v670_v54, %v2612_v51  ;;  %v668_v32 = vpop.permute.xlu0 %667  ;;  %v3533_v44 = vld [vmem:[#allocation10_spill] sm:$0xff] }
 0x129   : > { %v2811_v26 = vadd.f32 %v668_v32, %v2615_v37  ;;  %v450_v54 = vmul.f32 0.125, %v3533_v44 }
 0x12d   : > { %848 = vrot.lane.b32.xlu2 %v435_v63, %s2093_s15  ;;  %846 = vrot.lane.b32.xlu1 %v434_v58, %s2093_s15  ;;  %v632_v63 = vadd.f32 %v2645_v61, %v434_v58 }
 0x12e   : > { %844 = vrot.lane.b32.xlu0 %v433_v55, %s2093_s15 }
 0x12f   : > { %v696_v25 = vpop.permute.xlu2 %695  ;;  %v676_v36 = vpop.permute.xlu1 %675 }
 0x130   : > { %v2819_v51 = vadd.f32 %v696_v25, %v639_v49  ;;  %v2822_v39 = vadd.f32 %v676_v36, %v2632_v23  ;;  %v674_v37 = vpop.permute.xlu0 %673  ;;  %v631_v23 = vadd.f32 %v2647_v62, %v433_v55 }
 0x131   : > { %v2825_v47 = vadd.f32 %v674_v37, %v2635_v45 }
 0x135   : > { %866 = vrot.lane.b32.xlu2 %v444_v59, %s2093_s15  ;;  %864 = vrot.lane.b32.xlu1 %v2690_v15, %s2093_s15  ;;  %v447_v15 = vmul.f32 0.125, %v3532_v30 }
 0x136   : > { %862 = vrot.lane.b32.xlu0 %v2697_v60, %s2093_s15 }
 0x137   : > { %v702_v3 = vpop.permute.xlu2 %701  ;;  %v682_v12 = vpop.permute.xlu1 %681  ;;  %v645_v42 = vadd.f32 %v2661_v4, %v447_v15  ;;  %v648_v4 = vadd.f32 %v2681_v10, %v450_v54 }
 0x138   : > { %v2836_v45 = vadd.f32 %v702_v3, %v642_v56  ;;  %v2838_v33 = vadd.f32 %v682_v12, %v632_v63  ;;  %v680_v2 = vpop.permute.xlu0 %679 }
 0x139   : > { %v2840_v38 = vadd.f32 %v680_v2, %v631_v23 }
 0x13d   : > { %872 = vrot.lane.b32.xlu2 %v447_v15, %s2093_s15  ;;  %870 = vrot.lane.b32.xlu1 %v2713_v11, %s2093_s15 }
 0x13e   : > { %868 = vrot.lane.b32.xlu0 %v2718_v19, %s2093_s15 }
 0x13f   : > { %v708_v61 = vpop.permute.xlu2 %707  ;;  %v688_v62 = vpop.permute.xlu1 %687 }
 0x140   : > { %v2849_v60 = vadd.f32 %v708_v61, %v645_v42  ;;  %v2852_v29 = vadd.f32 %v688_v62, %v2664_v50  ;;  %v686_v9 = vpop.permute.xlu0 %685 }
 0x141   : > { %v2855_v43 = vadd.f32 %v686_v9, %v2667_v35 }
 0x145   : > { %878 = vrot.lane.b32.xlu2 %v450_v54, %s2093_s15  ;;  %876 = vrot.lane.b32.xlu1 %v2733_v8, %s2093_s15 }
 0x146   : > { %874 = vrot.lane.b32.xlu0 %v2740_v48, %s2093_s15  ;;  %s1908_s15 = sshll.u32 %s3570_s20, 2 }
 0x147   : > { %v714_v11 = vpop.permute.xlu2 %713  ;;  %v694_v19 = vpop.permute.xlu1 %693 }
 0x148   : > { %v2864_v50 = vadd.f32 %v714_v11, %v648_v4  ;;  %v2867_v32 = vadd.f32 %v694_v19, %v2684_v57  ;;  %v692_v35 = vpop.permute.xlu0 %691 }
 0x149   : > { %v2870_v58 = vadd.f32 %v692_v35, %v2687_v41 }
 0x14f   : > { %v819_v53 = vpop.permute.xlu2 %818  ;;  %v700_v55 = vpop.permute.xlu1 %699 }
 0x150   : > { %v915_v8 = vadd.f32 %v819_v53, %v2702_v5  ;;  %v2874_v10 = vadd.f32 %v700_v55, %v2705_v1  ;;  %v698_v49 = vpop.permute.xlu0 %697 }
 0x151   : > { %v2877_v48 = vadd.f32 %v698_v49, %v2708_v21 }
 0x152   : > { %v970_v63 = vmul.f32 0.375, %v915_v8 }
 0x154   : > { %v1038_v15 = vrot.slane %v970_v63, 1  ;;  %v1138_v61 = vrot.slane %v970_v63, 2 }
 0x157   : > { %v825_v25 = vpop.permute.xlu2 %824  ;;  %v706_v36 = vpop.permute.xlu1 %705 }
 0x158   : > { %v918_v57 = vadd.f32 %v825_v25, %v2723_v22  ;;  %v2881_v37 = vadd.f32 %v706_v36, %v2726_v16  ;;  %v704_v41 = vpop.permute.xlu0 %703  ;;  %v1234_v22 = vmul.f32 0.125, %v915_v8 }
 0x159   : > { %v2884_v18 = vadd.f32 %v704_v41, %v2729_v6 }
 0x15a   : > { %v973_v11 = vmul.f32 0.375, %v918_v57  ;;  %v1235_v19 = vmul.f32 0.125, %v918_v57 }
 0x15f   : > { %v835_v59 = vpop.permute.xlu2 %834  ;;  %v712_v5 = vpop.permute.xlu1 %711 }
 0x160   : > { %v2887_v1 = vadd.f32 %v712_v5, %v2748_v13  ;;  %v710_v56 = vpop.permute.xlu0 %709  ;;  %v923_v62 = vadd.f32 %v835_v59, %v2808_v24 }
 0x161   : > { %v2890_v21 = vadd.f32 %v710_v56, %v2751_v17  ;;  %v1282_v17 = vrot.slane %v1234_v22, 3 }
 0x162   : > { %v2899_v24 = vmul.f32 0.375, %v923_v62 }
 0x167   : > { %v841_v23 = vpop.permute.xlu2 %840  ;;  %v817_v3 = vpop.permute.xlu1 %816 }
 0x168   : > { %v914_v16 = vadd.f32 %v817_v3, %v2763_v7  ;;  %v815_v12 = vpop.permute.xlu0 %814  ;;  %v926_v56 = vadd.f32 %v841_v23, %v2822_v39 }
 0x169   : > { %v913_v2 = vadd.f32 %v815_v12, %v2766_v34  ;;  %v1143_v12 = vrot.slane %v973_v11, 2 }
 0x16a   : > { %v947_v6 = vmul.f32 0.125, %v914_v16  ;;  %v969_v30 = vmul.f32 0.375, %v914_v16  ;;  %v1043_v16 = vrot.slane %v973_v11, 1  ;;  %v2910_v23 = vmul.f32 0.375, %v926_v56 }
 0x16b   : > { %v946_v13 = vmul.f32 0.125, %v913_v2  ;;  %v968_v42 = vmul.f32 0.375, %v913_v2 }
 0x16c   : > { %v1036_v9 = vrot.slane %v969_v30, 1  ;;  %v1136_v44 = vrot.slane %v969_v30, 2  ;;  %v1280_v54 = vrot.slane %v947_v6, 3 }
 0x16d   : > { %v1035_v4 = vrot.slane %v968_v42, 1  ;;  %v1135_v7 = vrot.slane %v968_v42, 2  ;;  %v1279_v35 = vrot.slane %v946_v13, 3 }
 0x16e   : > { %v1039_v34 = vsel %vm1034_vm0, %v1036_v9, %v1038_v15  ;;  %v1139_v55 = vsel %vm1134_vm1, %v1136_v44, %v1138_v61  ;;  %v1283_v8 = vsel %vm1278_vm2, %v1280_v54, %v1282_v17  ;;  %v1287_v61 = vrot.slane %v1235_v19, 3 }
 0x16f   : > { %v1113_v53 = vadd.f32 %v1039_v34, %v947_v6  ;;  %v1037_v49 = vsel %vm1034_vm0, %v1035_v4, %v1036_v9  ;;  %v853_v25 = vpop.permute.xlu2 %852  ;;  %v823_v36 = vpop.permute.xlu1 %822  ;;  %v1137_v59 = vsel %vm1134_vm1, %v1135_v7, %v1136_v44  ;;  %v1281_v5 = vsel %vm1278_vm2, %v1279_v35, %v1280_v54 }
 0x170   : > { %v1112_v41 = vadd.f32 %v1037_v49, %v946_v13  ;;  %v821_v57 = vpop.permute.xlu0 %820  ;;  %v917_v3 = vadd.f32 %v823_v36, %v2778_v31  ;;  %v932_v6 = vadd.f32 %v853_v25, %v2852_v29  ;;  %v2907_v17 = vmul.f32 0.125, %v923_v62 }
 0x171   : > { %v1213_v63 = vadd.f32 %v1139_v55, %v1113_v53  ;;  %v916_v22 = vadd.f32 %v821_v57, %v2781_v40  ;;  %v1051_v9 = vrot.slane %v2899_v24, 1  ;;  %v1151_v54 = vrot.slane %v2899_v24, 2 }
 0x172   : > { %v1212_v2 = vadd.f32 %v1137_v59, %v1112_v41  ;;  %v949_v15 = vmul.f32 0.125, %v917_v3  ;;  %v972_v13 = vmul.f32 0.375, %v917_v3  ;;  %v2913_v4 = vmul.f32 0.125, %v926_v56 }
 0x173   : > { %v1357_v30 = vadd.f32 %v1283_v8, %v1213_v63  ;;  %v948_v42 = vmul.f32 0.125, %v916_v22  ;;  %v971_v29 = vmul.f32 0.375, %v916_v22  ;;  %v2915_v11 = vmul.f32 0.375, %v932_v6 }
 0x174   : > { %v1356_v39 = vadd.f32 %v1281_v5, %v1212_v2  ;;  %v1041_v31 = vrot.slane %v972_v13, 1  ;;  %v1141_v44 = vrot.slane %v972_v13, 2  ;;  %v1285_v40 = vrot.slane %v949_v15, 3 }
 0x175   : > { %v1284_v7 = vrot.slane %v948_v42, 3  ;;  %v1040_v8 = vrot.slane %v971_v29, 1  ;;  %v1140_v49 = vrot.slane %v971_v29, 2  ;;  %v1295_v41 = vrot.slane %v2907_v17, 3 }
 0x176   : > { %v1044_v19 = vsel %vm1034_vm0, %v1041_v31, %v1043_v16  ;;  %v1144_v62 = vsel %vm1134_vm1, %v1141_v44, %v1143_v12  ;;  %v1288_v34 = vsel %vm1278_vm2, %v1285_v40, %v1287_v61  ;;  %v1056_v59 = vrot.slane %v2910_v23, 1 }
 0x177   : > { %v859_v35 = vpop.permute.xlu2 %858  ;;  %v833_v53 = vpop.permute.xlu1 %832  ;;  %v1115_v55 = vadd.f32 %v1044_v19, %v949_v15  ;;  %v1286_v25 = vsel %vm1278_vm2, %v1284_v7, %v1285_v40  ;;  %v2923_v5 = vmul.f32 0.125, %v932_v6  ;;  %v1042_v63 = vsel %vm1034_vm0, %v1040_v8, %v1041_v31 }
 0x178   : > { %v827_v36 = vpop.permute.xlu0 %826  ;;  %v922_v57 = vadd.f32 %v833_v53, %v2811_v26  ;;  %v1142_v3 = vsel %vm1134_vm1, %v1140_v49, %v1141_v44  ;;  %v935_v22 = vadd.f32 %v859_v35, %v2867_v32  ;;  %v1156_v16 = vrot.slane %v2910_v23, 2 }
 0x179   : > { %v1215_v56 = vadd.f32 %v1144_v62, %v1115_v55  ;;  %v1300_v12 = vrot.slane %v2913_v4, 3  ;;  %v1114_v2 = vadd.f32 %v1042_v63, %v948_v42  ;;  %v1066_v13 = vrot.slane %v2915_v11, 1 }
 0x17a   : > { %v952_v15 = vmul.f32 0.125, %v922_v57  ;;  %v977_v6 = vmul.f32 0.375, %v922_v57  ;;  %v919_v40 = vadd.f32 %v827_v36, %v2798_v52  ;;  %v1379_v26 = vmul.f32 0.125, %v1357_v30 }
 0x17b   : > { %v1359_v61 = vadd.f32 %v1288_v34, %v1215_v56  ;;  %v3519_v29 = vrot.slane %v2915_v11, 2  ;;  %v3520_v31 = vrot.slane %v2923_v5, 3  ;;  %v1214_v44 = vadd.f32 %v1142_v3, %v1114_v2 }
 0x17c   : > { %v2935_v32 = vmul.f32 0.375, %v935_v22  ;;  %v1050_v19 = vrot.slane %v977_v6, 1  ;;  %v1150_v62 = vrot.slane %v977_v6, 2  ;;  %v1378_v35 = vmul.f32 0.125, %v1356_v39 }
 0x17d   : > { %v1395_v7 = vmul.f32 0.375, %v1359_v61  ;;  %v1358_v42 = vadd.f32 %v1286_v25, %v1214_v44  ;;  %v2937_v53 = vmul.f32 0.125, %v935_v22  ;;  %v1294_v55 = vrot.slane %v952_v15, 3 }
 0x17e   : > { %v1052_v52 = vsel %vm1034_vm0, %v1050_v19, %v1051_v9  ;;  %v1152_v30 = vsel %vm1134_vm1, %v1150_v62, %v1151_v54  ;;  %v2947_v36 = vmul.f32 0.125, %v919_v40  ;;  %v2952_v63 = vmul.f32 0.375, %v919_v40 }
 0x17f   : > { %v831_v34 = vpop.permute.xlu2 %830  ;;  %v839_v8 = vpop.permute.xlu1 %838  ;;  %v2939_v49 = vadd.f32 %v1395_v7, %v1379_v26  ;;  %v1394_v39 = vmul.f32 0.375, %v1358_v42  ;;  %v1118_v25 = vadd.f32 %v1052_v52, %v952_v15  ;;  %v1296_v56 = vsel %vm1278_vm2, %v1294_v55, %v1295_v41 }
 0x180   : > { %v837_v57 = vpop.permute.xlu0 %836  ;;  %v3522_v3 = vrot.slane %v2935_v32, 1  ;;  %v921_v22 = vadd.f32 %v831_v34, %v2745_v28  ;;  %v925_v2 = vadd.f32 %v839_v8, %v2825_v47  ;;  %v3521_v44 = vrot.slane %v2935_v32, 2 }
 0x181   : > { %v924_v6 = vadd.f32 %v837_v57, %v2760_v0  ;;  %v2958_v26 = vadd.f32 %v1394_v39, %v1378_v35  ;;  %v1218_v7 = vadd.f32 %v1152_v30, %v1118_v25  ;;  %v2962_v19 = vmul.f32 0.125, %v1359_v61 }
 0x182   : > { %v2964_v62 = vmul.f32 0.375, %v921_v22  ;;  %v954_v40 = vmul.f32 0.125, %v925_v2  ;;  %v980_v55 = vmul.f32 0.375, %v925_v2  ;;  %v2967_v8 = vmul.f32 0.125, %v1358_v42 }
 0x183   : > { %v1362_v52 = vadd.f32 %v1296_v56, %v1218_v7  ;;  %v979_v34 = vmul.f32 0.375, %v924_v6  ;;  %v1237_v47 = vmul.f32 0.125, %v924_v6  ;;  %v2972_v61 = vmul.f32 0.125, %v921_v22 }
 0x184   : > { %v1055_v57 = vrot.slane %v980_v55, 1  ;;  %v1155_v39 = vrot.slane %v980_v55, 2  ;;  %v1299_v25 = vrot.slane %v954_v40, 3 }
 0x185   : > { %v1053_v6 = vrot.slane %v979_v34, 1  ;;  %v1153_v42 = vrot.slane %v979_v34, 2  ;;  %v1297_v7 = vrot.slane %v1237_v47, 3 }
 0x186   : > { %v1057_v56 = vsel %vm1034_vm0, %v1055_v57, %v1056_v59  ;;  %v1157_v35 = vsel %vm1134_vm1, %v1155_v39, %v1156_v16  ;;  %v1301_v22 = vsel %vm1278_vm2, %v1299_v25, %v1300_v12 }
 0x187   : > { %v849_v15 = vpop.permute.xlu2 %848  ;;  %v851_v2 = vpop.permute.xlu1 %850  ;;  %v1120_v0 = vadd.f32 %v1057_v56, %v954_v40  ;;  %v1054_v30 = vsel %vm1034_vm0, %v1051_v9, %v1053_v6  ;;  %v1154_v34 = vsel %vm1134_vm1, %v1151_v54, %v1153_v42  ;;  %v1298_v40 = vsel %vm1278_vm2, %v1295_v41, %v1297_v7 }
 0x188   : > { %v843_v28 = vpop.permute.xlu0 %842  ;;  %v930_v55 = vadd.f32 %v849_v15, %v2793_v14  ;;  %v931_v47 = vadd.f32 %v851_v2, %v2855_v43  ;;  %v1119_v25 = vadd.f32 %v1054_v30, %v2907_v17  ;;  %v3000_v54 = vmul.f32 0.125, %v1362_v52 }
 0x189   : > { %v1220_v39 = vadd.f32 %v1157_v35, %v1120_v0  ;;  %v927_v24 = vadd.f32 %v843_v28, %v2776_v27  ;;  %v3004_v43 = vmul.f32 0.375, %v1362_v52 }
 0x18a   : > { %v2996_v14 = vmul.f32 0.375, %v930_v55  ;;  %v958_v9 = vmul.f32 0.125, %v931_v47  ;;  %v986_v56 = vmul.f32 0.375, %v931_v47  ;;  %v1219_v42 = vadd.f32 %v1154_v34, %v1119_v25 }
 0x18b   : > { %v1364_v6 = vadd.f32 %v1301_v22, %v1220_v39  ;;  %v3002_v41 = vmul.f32 0.125, %v930_v55  ;;  %v982_v15 = vmul.f32 0.375, %v927_v24  ;;  %v1238_v22 = vmul.f32 0.125, %v927_v24 }
 0x18c   : > { %v1065_v2 = vrot.slane %v986_v56, 1  ;;  %v1165_v0 = vrot.slane %v986_v56, 2  ;;  %v1309_v35 = vrot.slane %v958_v9, 3  ;;  %v1363_v30 = vadd.f32 %v1298_v40, %v1219_v42 }
 0x18d   : > { %v3006_v17 = vmul.f32 0.375, %v1364_v6  ;;  %v1058_v56 = vrot.slane %v982_v15, 1  ;;  %v1158_v42 = vrot.slane %v982_v15, 2  ;;  %v3025_v7 = vmul.f32 0.125, %v1364_v6 }
 0x18e   : > { %v1067_v27 = vsel %vm1034_vm0, %v1065_v2, %v1066_v13  ;;  %v1167_v52 = vsel %vm1134_vm1, %v1165_v0, %v3519_v29  ;;  %v1311_v28 = vsel %vm1278_vm2, %v1309_v35, %v3520_v31  ;;  %v1302_v2 = vrot.slane %v1238_v22, 3 }
 0x18f   : > { %v867_v47 = vpop.permute.xlu2 %866  ;;  %v857_v57 = vpop.permute.xlu1 %856  ;;  %v3020_v34 = vadd.f32 %v3006_v17, %v3000_v54  ;;  %v1124_v25 = vadd.f32 %v1067_v27, %v958_v9  ;;  %v1059_v31 = vsel %vm1034_vm0, %v1056_v59, %v1058_v56  ;;  %v1159_v9 = vsel %vm1134_vm1, %v1156_v16, %v1158_v42 }
 0x190   : > { %v855_v55 = vpop.permute.xlu0 %854  ;;  %v939_v0 = vadd.f32 %v867_v47, %v2836_v45  ;;  %v934_v24 = vadd.f32 %v857_v57, %v2870_v58  ;;  %v1303_v15 = vsel %vm1278_vm2, %v1300_v12, %v1302_v2  ;;  %v3040_v6 = vmul.f32 0.125, %v1363_v30 }
 0x191   : > { %v1224_v29 = vadd.f32 %v1167_v52, %v1124_v25  ;;  %v933_v35 = vadd.f32 %v855_v55, %v2805_v20  ;;  %v1121_v58 = vadd.f32 %v1059_v31, %v2913_v4  ;;  %v3043_v57 = vmul.f32 0.375, %v1363_v30 }
 0x192   : > { %v3038_v45 = vmul.f32 0.375, %v939_v0  ;;  %v960_v20 = vmul.f32 0.125, %v934_v24  ;;  %v3045_v27 = vmul.f32 0.125, %v939_v0  ;;  %v989_v59 = vmul.f32 0.375, %v934_v24 }
 0x193   : > { %v1368_v47 = vadd.f32 %v1311_v28, %v1224_v29  ;;  %v988_v23 = vmul.f32 0.375, %v933_v35  ;;  %v1221_v16 = vadd.f32 %v1159_v9, %v1121_v58  ;;  %v1240_v42 = vmul.f32 0.125, %v933_v35 }
 0x194   : > { %v1070_v56 = vrot.slane %v989_v59, 1  ;;  %v1170_v29 = vrot.slane %v989_v59, 2  ;;  %v1314_v28 = vrot.slane %v960_v20, 3  ;;  %v3534_v58 = vrot.slane %v2937_v53, 3 }
 0x195   : > { %v3047_v52 = vmul.f32 0.125, %v1368_v47  ;;  %v1068_v4 = vrot.slane %v988_v23, 1  ;;  %v1365_v31 = vadd.f32 %v1303_v15, %v1221_v16  ;;  %v1168_v30 = vrot.slane %v988_v23, 2 }
 0x196   : > { %v1072_v24 = vsel %vm1034_vm0, %v1070_v56, %v3522_v3  ;;  %v1172_v9 = vsel %vm1134_vm1, %v1170_v29, %v3521_v44  ;;  %v1316_v59 = vsel %vm1278_vm2, %v1314_v28, %v3534_v58  ;;  %v3064_v35 = vmul.f32 0.375, %v1368_v47 }
 0x197   : > { %v873_v55 = vpop.permute.xlu2 %872  ;;  %v829_v25 = vpop.permute.xlu1 %828  ;;  %v1069_v15 = vsel %vm1034_vm0, %v1066_v13, %v1068_v4  ;;  %v1126_v23 = vadd.f32 %v1072_v24, %v960_v20  ;;  %v1312_v29 = vrot.slane %v1240_v42, 3  ;;  %v3081_v20 = vmul.f32 0.125, %v1365_v31 }
 0x198   : > { %v942_v2 = vadd.f32 %v873_v55, %v2849_v60  ;;  %v861_v0 = vpop.permute.xlu0 %860  ;;  %v3066_v60 = vmul.f32 0.375, %v1365_v31  ;;  %v1125_v16 = vadd.f32 %v1069_v15, %v2923_v5  ;;  %v3535_v55 = vrot.slane %v2915_v11, 2 }
 0x199   : > { %v1226_v13 = vadd.f32 %v1172_v9, %v1126_v23  ;;  %v920_v4 = vadd.f32 %v829_v25, %v2795_v46  ;;  %v3536_v11 = vrot.slane %v2923_v5, 3  ;;  %v936_v25 = vadd.f32 %v861_v0, %v2819_v51 }
 0x19a   : > { %v1169_v56 = vsel %vm1134_vm1, %v3535_v55, %v1168_v30  ;;  %v3072_v12 = vmul.f32 0.375, %v942_v2  ;;  %v3074_v22 = vmul.f32 0.125, %v942_v2  ;;  %v3078_v28 = vadd.f32 %v3066_v60, %v3040_v6 }
 0x19b   : > { %v1225_v47 = vadd.f32 %v1169_v56, %v1125_v16  ;;  %v1313_v30 = vsel %vm1278_vm2, %v3536_v11, %v1312_v29  ;;  %v1370_v2 = vadd.f32 %v1316_v59, %v1226_v13  ;;  %v951_v15 = vmul.f32 0.125, %v920_v4 }
 0x19c   : > { %v975_v55 = vmul.f32 0.375, %v920_v4  ;;  %v1241_v51 = vmul.f32 0.125, %v936_v25  ;;  %v3537_v0 = vrot.slane %v2952_v63, 1  ;;  %v3540_v46 = vrot.slane %v2964_v62, 2 }
 0x19d   : > { %v1369_v58 = vadd.f32 %v1313_v30, %v1225_v47  ;;  %v3092_v23 = vmul.f32 0.125, %v1370_v2  ;;  %v3094_v5 = vmul.f32 0.375, %v1370_v2  ;;  %v1290_v13 = vrot.slane %v951_v15, 3 }
 0x19e   : > { %v1046_v56 = vrot.slane %v975_v55, 1  ;;  %v1146_v29 = vrot.slane %v975_v55, 2  ;;  %v991_v47 = vmul.f32 0.375, %v936_v25  ;;  %v3539_v2 = vrot.slane %v2952_v63, 2 }
 0x19f   : > { %v879_v40 = vpop.permute.xlu2 %878  ;;  %v847_v39 = vpop.permute.xlu1 %846  ;;  %v3096_v16 = vmul.f32 0.125, %v1369_v58  ;;  %v3101_v4 = vadd.f32 %v3094_v5, %v3047_v52  ;;  %v3103_v11 = vmul.f32 0.375, %v1369_v58  ;;  %v3541_v42 = vrot.slane %v2947_v36, 3 }
 0x1a0   : > { %v945_v31 = vadd.f32 %v879_v40, %v2864_v50  ;;  %v929_v59 = vadd.f32 %v847_v39, %v2838_v33  ;;  %v845_v40 = vpop.permute.xlu0 %844  ;;  %v1047_v30 = vsel %vm1034_vm0, %v3537_v0, %v1046_v56  ;;  %v3538_v33 = vrot.slane %v2964_v62, 1 }
 0x1a1   : > { %v1147_v55 = vsel %vm1134_vm1, %v3539_v2, %v1146_v29  ;;  %v1149_v58 = vsel %vm1134_vm1, %v1146_v29, %v3540_v46  ;;  %v1116_v25 = vadd.f32 %v1047_v30, %v2947_v36  ;;  %v1291_v24 = vsel %vm1278_vm2, %v3541_v42, %v1290_v13 }
 0x1a2   : > { %v3105_v50 = vmul.f32 0.375, %v945_v31  ;;  %v1049_v39 = vsel %vm1034_vm0, %v1046_v56, %v3538_v33  ;;  %v3542_v0 = vrot.slane %v2972_v61, 3  ;;  %v1073_v56 = vrot.slane %v991_v47, 1 }
 0x1a3   : > { %v1117_v9 = vadd.f32 %v1049_v39, %v951_v15  ;;  %v1173_v33 = vrot.slane %v991_v47, 2  ;;  %v1317_v63 = vrot.slane %v1241_v51, 3  ;;  %v3126_v3 = vmul.f32 0.125, %v945_v31 }
 0x1a4   : > { %v1293_v44 = vsel %vm1278_vm2, %v1290_v13, %v3542_v0  ;;  %v1216_v2 = vadd.f32 %v1147_v55, %v1116_v25  ;;  %v3543_v36 = vrot.slane %v2935_v32, 1  ;;  %v3544_v61 = vrot.slane %v2935_v32, 2 }
 0x1a5   : > { %v1217_v62 = vadd.f32 %v1149_v58, %v1117_v9  ;;  %v3545_v47 = vrot.slane %v2937_v53, 3  ;;  %v957_v51 = vmul.f32 0.125, %v929_v59  ;;  %v984_v55 = vmul.f32 0.375, %v929_v59 }
 0x1a6   : > { %v1074_v42 = vsel %vm1034_vm0, %v3543_v36, %v1073_v56  ;;  %v1174_v13 = vsel %vm1134_vm1, %v3544_v61, %v1173_v33  ;;  %v1360_v30 = vadd.f32 %v1291_v24, %v1216_v2  ;;  %v1332_v58 = vrot.slane %v3126_v3, 3 }
 0x1a7   : > { %v865_v15 = vpop.permute.xlu1 %864  ;;  %v1318_v31 = vsel %vm1278_vm2, %v3545_v47, %v1317_v63  ;;  %v1361_v9 = vadd.f32 %v1293_v44, %v1217_v62  ;;  %v1127_v39 = vadd.f32 %v1074_v42, %v2937_v53  ;;  %v1305_v25 = vrot.slane %v957_v51, 3 }
 0x1a8   : > { %v928_v0 = vadd.f32 %v845_v40, %v2840_v38  ;;  %v938_v56 = vadd.f32 %v865_v15, %v2874_v10  ;;  %v1382_v32 = vmul.f32 0.125, %v1360_v30  ;;  %v1396_v33 = vmul.f32 0.375, %v1360_v30  ;;  %v863_v10 = vpop.permute.xlu0 %862 }
 0x1a9   : > { %v1383_v36 = vmul.f32 0.125, %v1361_v9  ;;  %v1397_v61 = vmul.f32 0.375, %v1361_v9  ;;  %v1227_v29 = vadd.f32 %v1174_v13, %v1127_v39  ;;  %v1061_v46 = vrot.slane %v984_v55, 1 }
 0x1aa   : > { %v1161_v63 = vrot.slane %v984_v55, 2  ;;  %v3546_v24 = vrot.slane %v3002_v41, 3  ;;  %v1412_v53 = vadd.f32 %v1396_v33, %v2967_v8  ;;  %v1414_v2 = vadd.f32 %v3004_v43, %v1382_v32 }
 0x1ab   : > { %v1413_v59 = vadd.f32 %v1397_v61, %v2962_v19  ;;  %v1415_v38 = vadd.f32 %v3043_v57, %v1383_v36  ;;  %v1428_v40 = vadd.f32 %v2958_v26, %v1396_v33  ;;  %v1429_v62 = vadd.f32 %v2939_v49, %v1397_v61 }
 0x1ac   : > { %v1308_v44 = vsel %vm1278_vm2, %v1305_v25, %v3546_v24  ;;  %v1371_v15 = vadd.f32 %v1318_v31, %v1227_v29  ;;  %v3547_v42 = vrot.slane %v2996_v14, 1  ;;  %v3156_v13 = vadd.f32 %v1412_v53, %v3004_v43 }
 0x1ad   : > { %v1431_v8 = vadd.f32 %v1413_v59, %v3043_v57  ;;  %v3548_v47 = vrot.slane %v2996_v14, 2  ;;  %v3163_v9 = vadd.f32 %v1428_v40, %v3000_v54  ;;  %v3166_v49 = vadd.f32 %v1429_v62, %v3040_v6 }
 0x1ae   : > { %v1064_v41 = vsel %vm1034_vm0, %v1061_v46, %v3547_v42  ;;  %v1407_v26 = vmul.f32 0.375, %v1371_v15  ;;  %v937_v29 = vadd.f32 %v863_v10, %v2877_v48  ;;  %v1433_v57 = vadd.f32 %v1415_v38, %v3066_v60 }
 0x1af   : > { %v1123_v19 = vadd.f32 %v1064_v41, %v957_v51  ;;  %v1164_v30 = vsel %vm1134_vm1, %v1161_v63, %v3548_v47  ;;  %v3170_v31 = vadd.f32 %v1431_v8, %v3081_v20  ;;  %v3174_v51 = vadd.f32 %v1414_v2, %v3006_v17 }
 0x1b0   : > { %v1469_v14 = vrot.slane %v3163_v9, 4  ;;  %v3177_v39 = vmul.f32 0.125, %v1371_v15  ;;  %v3180_v54 = vadd.f32 %v1407_v26, %v3096_v16  ;;  %v956_v6 = vmul.f32 0.125, %v928_v0 }
 0x1b1   : > { %v1223_v43 = vadd.f32 %v1164_v30, %v1123_v19  ;;  %v1581_v55 = vrot.slane %v3166_v49, 4  ;;  %v983_v32 = vmul.f32 0.375, %v928_v0  ;;  %v963_v36 = vmul.f32 0.125, %v938_v56 }
 0x1b2   : > { %v1304_v33 = vrot.slane %v956_v6, 3  ;;  %v993_v61 = vmul.f32 0.375, %v938_v56  ;;  %v962_v24 = vmul.f32 0.125, %v937_v29  ;;  %v992_v60 = vmul.f32 0.375, %v937_v29 }
 0x1b3   : > { %v1367_v48 = vadd.f32 %v1308_v44, %v1223_v43  ;;  %v1060_v59 = vrot.slane %v983_v32, 1  ;;  %v1160_v2 = vrot.slane %v983_v32, 2  ;;  %v1320_v62 = vrot.slane %v963_v36, 3  ;;  %v871_v43 = vpop.permute.xlu1 %870 }
 0x1b4   : > { %v1306_v38 = vsel %vm1278_vm2, %v1304_v33, %v1305_v25  ;;  %v1076_v10 = vrot.slane %v993_v61, 1  ;;  %v1176_v40 = vrot.slane %v993_v61, 2  ;;  %v3549_v8 = vrot.slane %v3038_v45, 1 }
 0x1b5   : > { %v1389_v53 = vmul.f32 0.125, %v1367_v48  ;;  %v1403_v17 = vmul.f32 0.375, %v1367_v48  ;;  %v1062_v56 = vsel %vm1034_vm0, %v1060_v59, %v1061_v46  ;;  %v1162_v41 = vsel %vm1134_vm1, %v1160_v2, %v1161_v63 }
 0x1b6   : > { %v1079_v19 = vsel %vm1034_vm0, %v1076_v10, %v3549_v8  ;;  %v3550_v25 = vrot.slane %v3038_v45, 2  ;;  %v1122_v29 = vadd.f32 %v1062_v56, %v956_v6  ;;  %v3551_v63 = vrot.slane %v3045_v27, 3 }
 0x1b7   : > { %v1419_v15 = vadd.f32 %v1403_v17, %v3081_v20  ;;  %v1421_v42 = vadd.f32 %v3103_v11, %v1389_v53  ;;  %v1435_v0 = vadd.f32 %v3078_v28, %v1403_v17  ;;  %v3187_v44 = vadd.f32 %v1433_v57, %v1389_v53 }
 0x1b8   : > { %v1179_v47 = vsel %vm1134_vm1, %v1176_v40, %v3550_v25  ;;  %v1593_v20 = vrot.slane %v3170_v31, 4  ;;  %v1129_v46 = vadd.f32 %v1079_v19, %v963_v36  ;;  %v1323_v57 = vsel %vm1278_vm2, %v1320_v62, %v3551_v63 }
 0x1b9   : > { %v1437_v30 = vadd.f32 %v1419_v15, %v3103_v11  ;;  %v3200_v28 = vadd.f32 %v1435_v0, %v3096_v16  ;;  %v1439_v48 = vadd.f32 %v1421_v42, %v1407_v26  ;;  %v1075_v32 = vrot.slane %v992_v60, 1  ;;  %v869_v11 = vpop.permute.xlu0 %868 }
 0x1ba   : > { %v1579_v33 = vrot.slane %v3187_v44, 4  ;;  %v1222_v61 = vadd.f32 %v1162_v41, %v1122_v29  ;;  %v1175_v53 = vrot.slane %v992_v60, 2  ;;  %v1229_v17 = vadd.f32 %v1179_v47, %v1129_v46 }
 0x1bb   : > { %v3206_v45 = vadd.f32 %v1437_v30, %v3177_v39  ;;  %v1077_v16 = vsel %vm1034_vm0, %v1075_v32, %v1076_v10  ;;  %v1319_v6 = vrot.slane %v962_v24, 3  ;;  %v941_v36 = vadd.f32 %v871_v43, %v2881_v37 }
 0x1bc   : > { %v1591_v27 = vrot.slane %v3200_v28, 4  ;;  %v1366_v59 = vadd.f32 %v1306_v38, %v1222_v61  ;;  %v1128_v2 = vadd.f32 %v1077_v16, %v962_v24  ;;  %v1177_v26 = vsel %vm1134_vm1, %v1175_v53, %v1176_v40  ;;  %v877_v16 = vpop.permute.xlu1 %876 }
 0x1bd   : > { %v1605_v15 = vrot.slane %v3206_v45, 4  ;;  %v1373_v42 = vadd.f32 %v1323_v57, %v1229_v17  ;;  %v1321_v0 = vsel %vm1278_vm2, %v1319_v6, %v1320_v62  ;;  %v996_v56 = vmul.f32 0.375, %v941_v36 }
 0x1be   : > { %v1388_v60 = vmul.f32 0.125, %v1366_v59  ;;  %v1402_v41 = vmul.f32 0.375, %v1366_v59  ;;  %v1228_v8 = vadd.f32 %v1177_v26, %v1128_v2  ;;  %v965_v19 = vmul.f32 0.125, %v941_v36 }
 0x1bf   : > { %v1409_v10 = vmul.f32 0.375, %v1373_v42  ;;  %v1445_v25 = vmul.f32 0.125, %v1373_v42  ;;  %v1081_v47 = vrot.slane %v996_v56, 1  ;;  %v1181_v37 = vrot.slane %v996_v56, 2 }
 0x1c0   : > { %v1418_v30 = vadd.f32 %v1402_v41, %v3025_v7  ;;  %v1420_v24 = vadd.f32 %v3064_v35, %v1388_v60  ;;  %v1434_v38 = vadd.f32 %v3020_v34, %v1402_v41  ;;  %v3219_v40 = vadd.f32 %v3174_v51, %v1388_v60 }
 0x1c1   : > { %v1425_v62 = vadd.f32 %v1409_v10, %v3177_v39  ;;  %v1441_v29 = vadd.f32 %v3180_v54, %v1409_v10  ;;  %v3223_v43 = vadd.f32 %v1445_v25, %v1439_v48  ;;  %v1372_v46 = vadd.f32 %v1321_v0, %v1228_v8 }
 0x1c2   : > { %v1436_v63 = vadd.f32 %v1418_v30, %v3064_v35  ;;  %v3227_v57 = vadd.f32 %v1434_v38, %v3047_v52  ;;  %v1438_v32 = vadd.f32 %v1420_v24, %v3094_v5  ;;  %v940_v61 = vadd.f32 %v869_v11, %v2884_v18  ;;  %v875_v18 = vpop.permute.xlu0 %874 }
 0x1c3   : > { %v1466_v34 = vrot.slane %v3219_v40, 4  ;;  %v1408_v51 = vmul.f32 0.375, %v1372_v46  ;;  %v1444_v53 = vmul.f32 0.125, %v1372_v46  ;;  %v3552_v39 = vrot.slane %v3072_v12, 1 }
 0x1c4   : > { %v3236_v48 = vadd.f32 %v1436_v63, %v3092_v23  ;;  %v1617_v35 = vrot.slane %v3223_v43, 4  ;;  %v3553_v52 = vrot.slane %v3072_v12, 2  ;;  %v1325_v59 = vrot.slane %v965_v19, 3 }
 0x1c5   : > { %v1084_v54 = vsel %vm1034_vm0, %v1081_v47, %v3552_v39  ;;  %v1424_v11 = vadd.f32 %v1408_v51, %v3092_v23  ;;  %v1440_v6 = vadd.f32 %v3101_v4, %v1408_v51  ;;  %v3244_v36 = vadd.f32 %v1444_v53, %v1438_v32 }
 0x1c6   : > { %v1131_v17 = vadd.f32 %v1084_v54, %v965_v19  ;;  %v1184_v5 = vsel %vm1134_vm1, %v1181_v37, %v3553_v52  ;;  %v1479_v2 = vrot.slane %v3227_v57, 4  ;;  %v964_v42 = vmul.f32 0.125, %v940_v61 }
 0x1c7   : > { %v995_v0 = vmul.f32 0.375, %v940_v61  ;;  %v1505_v56 = vrot.slane %v3244_v36, 4  ;;  %v3554_v12 = vrot.slane %v3074_v22, 3  ;;  %v944_v41 = vadd.f32 %v877_v16, %v2887_v1 }
 0x1c8   : > { %v1231_v26 = vadd.f32 %v1184_v5, %v1131_v17  ;;  %v943_v23 = vadd.f32 %v875_v18, %v2890_v21  ;;  %v1324_v19 = vrot.slane %v964_v42, 3  ;;  %v3555_v5 = vrot.slane %v3105_v50, 1 }
 0x1c9   : > { %v1328_v60 = vsel %vm1278_vm2, %v1325_v59, %v3554_v12  ;;  %v1080_v8 = vrot.slane %v995_v0, 1  ;;  %v1180_v10 = vrot.slane %v995_v0, 2  ;;  %v967_v25 = vmul.f32 0.125, %v944_v41 }
 0x1ca   : > { %v1375_v4 = vadd.f32 %v1328_v60, %v1231_v26  ;;  %v999_v30 = vmul.f32 0.375, %v944_v41  ;;  %v966_v24 = vmul.f32 0.125, %v943_v23  ;;  %v998_v38 = vmul.f32 0.375, %v943_v23 }
 0x1cb   : > { %v1082_v32 = vsel %vm1034_vm0, %v1080_v8, %v1081_v47  ;;  %v1182_v22 = vsel %vm1134_vm1, %v1180_v10, %v1181_v37  ;;  %v1326_v51 = vsel %vm1278_vm2, %v1324_v19, %v1325_v59  ;;  %v1330_v54 = vrot.slane %v967_v25, 3 }
 0x1cc   : > { %v1427_v46 = vmul.f32 0.375, %v1375_v4  ;;  %v1447_v63 = vmul.f32 0.125, %v1375_v4  ;;  %v1130_v61 = vadd.f32 %v1082_v32, %v964_v42  ;;  %v1086_v1 = vrot.slane %v999_v30, 1 }
 0x1cd   : > { %v1186_v53 = vrot.slane %v999_v30, 2  ;;  %v1085_v17 = vrot.slane %v998_v38, 1  ;;  %v3556_v18 = vrot.slane %v3105_v50, 2  ;;  %v1185_v37 = vrot.slane %v998_v38, 2 }
 0x1ce   : > { %v1443_v21 = vadd.f32 %v1427_v46, %v1425_v62  ;;  %v3256_v39 = vadd.f32 %v1447_v63, %v1441_v29  ;;  %v1230_v52 = vadd.f32 %v1182_v22, %v1130_v61  ;;  %v1089_v16 = vsel %vm1034_vm0, %v1086_v1, %v3555_v5 }
 0x1cf   : > { %v1189_v47 = vsel %vm1134_vm1, %v1186_v53, %v3556_v18  ;;  %v1133_v59 = vadd.f32 %v1089_v16, %v967_v25  ;;  %v1333_v62 = vsel %vm1278_vm2, %v1330_v54, %v1332_v58  ;;  %v1087_v29 = vsel %vm1034_vm0, %v1085_v17, %v1086_v1 }
 0x1d0   : > { %v1603_v26 = vrot.slane %v3256_v39, 4  ;;  %v1374_v42 = vadd.f32 %v1326_v51, %v1230_v52  ;;  %v1132_v0 = vadd.f32 %v1087_v29, %v966_v24  ;;  %v1187_v12 = vsel %vm1134_vm1, %v1185_v37, %v1186_v53 }
 0x1d1   : > { %v1329_v60 = vrot.slane %v966_v24, 3  ;;  %v1233_v41 = vadd.f32 %v1189_v47, %v1133_v59  ;;  %v1580_v50 = vsel %vm1467_vm3, %v1579_v33, %v3166_v49  ;;  %v2094_v58 = vmov 1983009808  }
 0x1d2   : > { %v1426_v23 = vmul.f32 0.375, %v1374_v42  ;;  %v1446_v4 = vmul.f32 0.125, %v1374_v42  ;;  %v1232_v8 = vadd.f32 %v1187_v12, %v1132_v0  ;;  %v1472_v19 = vunpack.c.l.s4 %v2094_v58 }
 0x1d3   : > { %v1331_v3 = vsel %vm1278_vm2, %v1329_v60, %v1330_v54  ;;  %v1377_v10 = vadd.f32 %v1333_v62, %v1233_v41  ;;  %v2095_v25 = vmov 1934713408   ;;  %v1592_v24 = vsel %vm1467_vm3, %v1591_v27, %v3170_v31 }
 0x1d4   : > { %v1520_v30 = vunpack.c.l.s4 %v2095_v25  ;;  %v1442_v38 = vadd.f32 %v1426_v23, %v1424_v11  ;;  %v3279_v46 = vadd.f32 %v1446_v4, %v1440_v6  ;;  %v1376_v63 = vadd.f32 %v1331_v3, %v1232_v8 }
 0x1d5   : > { %v1604_v33 = vsel %vm1467_vm3, %v1603_v26, %v3206_v45  ;;  %v1449_v32 = vmul.f32 0.125, %v1377_v10  ;;  %v3283_v22 = vunpack.c.0.s8 %v1472_v19  ;;  %v3289_v51 = vadd.f32 %v3156_v13, %v3025_v7 }
 0x1d6   : > { %v3285_v61 = vunpack.c.0.s8 %v1520_v30  ;;  %v1491_v1 = vrot.slane %v3279_v46, 4  ;;  %v1448_v53 = vmul.f32 0.125, %v1376_v63  ;;  %v1468_v27 = vsel %vm1467_vm3, %v1466_v34, %v3163_v9 }
 0x1d7   : > { %v1582_v11 = vsel %vm1467_vm3, %v3187_v44, %v1581_v55  ;;  %v1465_v6 = vadd.f32 %v1449_v32, %v1443_v21  ;;  %v1586_v54 = vperm.slane %v1580_v50, %v3283_v22  ;;  %v1598_v17 = vperm.slane %v1592_v24, %v3283_v22 }
 0x1d8   : > { %v1610_v7 = vperm.slane %v1604_v33, %v3283_v22  ;;  %v3303_v13 = vadd.f32 %v1448_v53, %v1442_v38  ;;  %v1474_v52 = vperm.slane %v1468_v27, %v3283_v22  ;;  %v1480_v34 = vsel %vm1467_vm3, %v1479_v2, %v3289_v51 }
 0x1d9   : > { %v1481_v49 = vrot.slane %v3289_v51, 4  ;;  %v1615_v5 = vrot.slane %v1465_v6, 4  ;;  %v1618_v55 = vsel %vm1467_vm3, %v1465_v6, %v1617_v35  ;;  %v1627_v44 = vrot.slane %v1598_v17, 4 }
 0x1da   : > { %v1486_v21 = vperm.slane %v1480_v34, %v3283_v22  ;;  %v1503_v16 = vrot.slane %v3303_v13, 4  ;;  %v1492_v18 = vsel %vm1467_vm3, %v1491_v1, %v3236_v48  ;;  %v1517_v47 = vrot.slane %v1474_v52, 4 }
 0x1db   : > { %v1629_v37 = vrot.slane %v1586_v54, 4  ;;  %v1616_v2 = vsel %vm1467_vm3, %v1615_v5, %v3223_v43  ;;  %v1628_v26 = vsel %vm1467_vm3, %v1627_v44, %v1586_v54  ;;  %v1498_v59 = vperm.slane %v1492_v18, %v3283_v22 }
 0x1dc   : > { %v1515_v62 = vrot.slane %v1486_v21, 4  ;;  %v1622_v35 = vperm.slane %v1616_v2, %v3283_v22  ;;  %v3324_v29 = vperm.slane %v1628_v26, %v3285_v61  ;;  %v1504_v42 = vsel %vm1467_vm3, %v1503_v16, %v3244_v36 }
 0x1dd   : > { %v1518_v0 = vsel %vm1467_vm3, %v1486_v21, %v1517_v47  ;;  %v1510_v12 = vperm.slane %v1504_v42, %v3283_v22  ;;  %v1541_v43 = vrot.slane %v1498_v59, 4  ;;  %v1630_v8 = vsel %vm1467_vm3, %v1598_v17, %v1629_v37 }
 0x1de   : > { %v1526_v60 = vperm.slane %v1518_v0, %v3285_v61  ;;  %v1516_v41 = vsel %vm1467_vm3, %v1515_v62, %v1474_v52  ;;  %v1651_v50 = vrot.slane %v1622_v35, 4  ;;  %v1677_v23 = vrot.slane %v3324_v29, 4 }
 0x1df   : > { %v3334_v4 = vperm.slane %v1516_v41, %v3285_v61  ;;  %v1542_v3 = vsel %vm1467_vm3, %v1510_v12, %v1541_v43  ;;  %v1539_v10 = vrot.slane %v1510_v12, 4  ;;  %v1638_v19 = vperm.slane %v1630_v8, %v3285_v61 }
 0x1e0   : > { %v1569_v58 = vrot.slane %v1526_v60, 4  ;;  %v1652_v25 = vsel %vm1467_vm3, %v1651_v50, %v1610_v7  ;;  %v1550_v30 = vperm.slane %v1542_v3, %v3285_v61  ;;  %v1653_v38 = vrot.slane %v1610_v7, 4 }
 0x1e1   : > { %v1565_v24 = vrot.slane %v3334_v4, 4  ;;  %v3343_v63 = vperm.slane %v1652_v25, %v3285_v61  ;;  %v1540_v33 = vsel %vm1467_vm3, %v1539_v10, %v1498_v59  ;;  %v1681_v32 = vrot.slane %v1638_v19, 4 }
 0x1e2   : > { %v1590_v51 = vperm.slane %v1582_v11, %v3283_v22  ;;  %v1567_v1 = vrot.slane %v1550_v30, 4  ;;  %v3348_v53 = vperm.slane %v1540_v33, %v3285_v61  ;;  %v1570_v27 = vsel %vm1467_vm3, %v1550_v30, %v1569_v58 }
 0x1e3   : > { %v1654_v6 = vsel %vm1467_vm3, %v1622_v35, %v1653_v38  ;;  %v1678_v54 = vsel %vm1467_vm3, %v3343_v63, %v1677_v23  ;;  %v1675_v17 = vrot.slane %v3343_v63, 4  ;;  %v1594_v11 = vsel %vm1467_vm3, %v3200_v28, %v1593_v20 }
 0x1e4   : > { %v1662_v7 = vperm.slane %v1654_v6, %v3285_v61  ;;  %1720 = vrot.lane.b32.xlu1 %v1678_v54, %s2096_s16  ;;  %v1568_v52 = vsel %vm1467_vm3, %v1567_v1, %v1526_v60  ;;  %v1563_v34 = vrot.slane %v3348_v53, 4  ;;  %v1566_v5 = vsel %vm1467_vm3, %v3348_v53, %v1565_v24 }
 0x1e5   : > { %v1602_v44 = vperm.slane %v1594_v11, %v3283_v22  ;;  %1696 = vrot.lane.b32.xlu2 %v1568_v52, %s2097_s1  ;;  %1692 = vrot.lane.b32.xlu0 %v1566_v5, %s2096_s16  ;;  %v1606_v20 = vsel %vm1467_vm3, %v3256_v39, %v1605_v15  ;;  %v1626_v28 = vperm.slane %v1618_v55, %v3283_v22  ;;  %v1493_v55 = vrot.slane %v3236_v48, 4  ;;  %v1911_v5 = vld [vmem:[%s2240_s8 + $0x18] sm:$0xff]  ;;  %s306_s16 = sadd.s32 %s1908_s15, %s1907_s14 }
 0x1e6   : > { %v1682_v31 = vsel %vm1467_vm3, %v1662_v7, %v1681_v32  ;;  %v1679_v21 = vrot.slane %v1662_v7, 4  ;;  %v1614_v16 = vperm.slane %v1606_v20, %v3283_v22  ;;  %v1470_v47 = vsel %vm1467_vm3, %v3219_v40, %v1469_v14 }
 0x1e7   : > { %v1639_v18 = vrot.slane %v1602_v44, 4  ;;  %v1482_v37 = vsel %vm1467_vm3, %v3227_v57, %v1481_v49  ;;  %v1663_v26 = vrot.slane %v1626_v28, 4  ;;  %v1478_v45 = vperm.slane %v1470_v47, %v3283_v22 }
 0x1e8   : > { %v1680_v2 = vsel %vm1467_vm3, %v1679_v21, %v1638_v19  ;;  %v1490_v15 = vperm.slane %v1482_v37, %v3283_v22  ;;  %v1506_v9 = vsel %vm1467_vm3, %v3303_v13, %v1505_v56  ;;  %v1641_v14 = vrot.slane %v1590_v51, 4 }
 0x1e9   : > { %v1640_v39 = vsel %vm1467_vm3, %v1639_v18, %v1590_v51  ;;  %v1664_v57 = vsel %vm1467_vm3, %v1663_v26, %v1614_v16  ;;  %v1514_v49 = vperm.slane %v1506_v9, %v3283_v22  ;;  %v1494_v35 = vsel %vm1467_vm3, %v3279_v46, %v1493_v55  ;;  %v1920_v18 = vld [vmem:[%s2240_s8 + $0x48] sm:$0xff]  ;;  %v309_v9 = vld [vmem:[%s2240_s8] sm:$0xff] }
 0x1ea   : > { %v1646_v40 = vperm.slane %v1640_v39, %v3285_v61  ;;  %v1527_v59 = vrot.slane %v1490_v15, 4  ;;  %v1670_v62 = vperm.slane %v1664_v57, %v3285_v61  ;;  %v1529_v42 = vrot.slane %v1478_v45, 4  ;;  %v1929_v39 = vld [vmem:[%s2240_s8 + $0x78] sm:$0xff]  ;;  %v1913_v57 = vld [vmem:[%s2240_s8 + $0x20] sm:$0xff] }
 0x1eb   : > { %v1642_v48 = vsel %vm1467_vm3, %v1602_v44, %v1641_v14  ;;  %v1502_v36 = vperm.slane %v1494_v35, %v3283_v22  ;;  %v1551_v13 = vrot.slane %v1514_v49, 4  ;;  %v1665_v41 = vrot.slane %v1614_v16, 4  ;;  %v1910_v14 = vld [vmem:[%s2240_s8 + $0x10] sm:$0xff] }
 0x1ec   : > { %v1528_v56 = vsel %vm1467_vm3, %v1527_v59, %v1478_v45  ;;  %v1650_v0 = vperm.slane %v1642_v48, %v3285_v61  ;;  %1700 = vrot.lane.b32.xlu1 %v1570_v27, %s2098_s27  ;;  %v1683_v12 = vrot.slane %v1670_v62, 4  ;;  %v1530_v43 = vsel %vm1467_vm3, %v1490_v15, %v1529_v42  ;;  %v1926_v45 = vld [vmem:[%s2240_s8 + $0x68] sm:$0xff]  ;;  %v1919_v59 = vld [vmem:[%s2240_s8 + $0x40] sm:$0xff] }
 0x1ed   : > { %v1534_v60 = vperm.slane %v1528_v56, %v3285_v61  ;;  %1728 = vrot.lane.b32.xlu2 %v1682_v31, %s2098_s27  ;;  %1724 = vrot.lane.b32.xlu0 %v1680_v2, %s2097_s1  ;;  %v1552_v46 = vsel %vm1467_vm3, %v1551_v13, %v1502_v36  ;;  %v1538_v22 = vperm.slane %v1530_v43, %v3285_v61  ;;  %v1553_v50 = vrot.slane %v1502_v36, 4  ;;  %v1914_v31 = vld [vmem:[%s2240_s8 + $0x28] sm:$0xff]  ;;  %v1923_v2 = vld [vmem:[%s2240_s8 + $0x58] sm:$0xff]  ;;  %s1909_s1 = sshll.u32 %s306_s16, 3 }
 0x1ee   : > { %v1685_v23 = vrot.slane %v1646_v40, 4  ;;  %v1684_v8 = vsel %vm1467_vm3, %v1683_v12, %v1646_v40  ;;  %v1558_v3 = vperm.slane %v1552_v46, %v3285_v61  ;;  %v1666_v58 = vsel %vm1467_vm3, %v1626_v28, %v1665_v41  ;;  %v1917_v28 = vld [vmem:[%s2240_s8 + $0x38] sm:$0xff]  ;;  %v1922_v36 = vld [vmem:[%s2240_s8 + $0x50] sm:$0xff]  ;;  %v1925_v56 = vld [vmem:[%s2240_s8 + $0x60] sm:$0xff]  ;;  %s308_s27 = scalar_lea.vmem %s3514_s4, %s1909_s1 }
 0x1ef   : > { %v1573_v10 = vrot.slane %v1534_v60, 4  ;;  %v1554_v19 = vsel %vm1467_vm3, %v1514_v49, %v1553_v50  ;;  %v1674_v25 = vperm.slane %v1666_v58, %v3285_v61  ;;  %v1689_v24 = vrot.slane %v1650_v0, 4  ;;  %v1916_v49 = vld [vmem:[%s2240_s8 + $0x30] sm:$0xff] }
 0x1f0   : > { %v1686_v30 = vsel %vm1467_vm3, %v1670_v62, %v1685_v23  ;;  %v1571_v33 = vrot.slane %v1558_v3, 4  ;;  %v1562_v32 = vperm.slane %v1554_v19, %v3285_v61  ;;  %v1577_v51 = vrot.slane %v1538_v22, 4  ;;  %v1928_v13 = vld [vmem:[%s2240_s8 + $0x70] sm:$0xff] }
 0x1f1   : > { %v1574_v38 = vsel %vm1467_vm3, %v1558_v3, %v1573_v10  ;;  %v1687_v1 = vrot.slane %v1674_v25, 4  ;;  %v1690_v53 = vsel %vm1467_vm3, %v1674_v25, %v1689_v24  ;;  %v3416_v27 = vsel %vm1467_vm3, %v1675_v17, %v3324_v29 }
 0x1f2   : > { %v3420_v6 = vsel %vm1467_vm3, %v1563_v34, %v3334_v4  ;;  %v1572_v54 = vsel %vm1467_vm3, %v1571_v33, %v1534_v60  ;;  %v1575_v7 = vrot.slane %v1562_v32, 4  ;;  %v1578_v11 = vsel %vm1467_vm3, %v1562_v32, %v1577_v51  ;;  %v310_v34 = vld [vmem:[%s2240_s8 + $0x8] sm:$0xff]  ;;  %s3475_s8 = sld [smem:[#allocation2]] }
 0x1f3   : > { %v1688_v61 = vsel %vm1467_vm3, %v1687_v1, %v1650_v0  ;;  %v312_v17 = vstv %s3426_s7  ;;  %v319_v44 = vstv %s3428_s29  ;;  %v326_v21 = vstv %s3430_s9 }
 0x1f4   : > { %1732 = vrot.lane.b32.xlu1 %v1684_v8, %s2099_s26  ;;  %v1576_v52 = vsel %vm1467_vm3, %v1575_v7, %v1538_v22  ;;  %v333_v16 = vstv %s3432_s11  ;;  %v340_v47 = vstv %s3434_s12  ;;  %v349_v26 = vstv %s3438_s5 }
 0x1f5   : > { %1708 = vrot.lane.b32.xlu2 %v1574_v38, %s2100_s30  ;;  %1704 = vrot.lane.b32.xlu0 %v1572_v54, %s2099_s26  ;;  %v358_v15 = vstv %s3444_s13  ;;  %v367_v55 = vstv %s3446_s17  ;;  %v314_v62 = vmul.f32 %v312_v17, %v310_v34  ;;  %v321_v35 = vmul.f32 %v1911_v5, %v319_v44 }
 0x1f6   : > { %v328_v42 = vmul.f32 %v1914_v31, %v326_v21  ;;  %v335_v48 = vmul.f32 %v1917_v28, %v333_v16  ;;  %v342_v0 = vmul.f32 %v1920_v18, %v340_v47  ;;  %v351_v12 = vmul.f32 %v1923_v2, %v349_v26 }
 0x1f7   : > { %v360_v60 = vmul.f32 %v1926_v45, %v358_v15  ;;  %v369_v43 = vmul.f32 %v1929_v39, %v367_v55  ;;  %v313_v41 = vmul.f32 %v312_v17, %v309_v9  ;;  %v320_v46 = vmul.f32 %v1910_v14, %v319_v44 }
 0x1f8   : > { %v327_v22 = vmul.f32 %v1913_v57, %v326_v21  ;;  %v334_v50 = vmul.f32 %v1916_v49, %v333_v16  ;;  %v341_v23 = vmul.f32 %v1919_v59, %v340_v47  ;;  %v350_v8 = vmul.f32 %v1922_v36, %v349_v26 }
 0x1f9   : > { %v359_v3 = vmul.f32 %v1925_v56, %v358_v15  ;;  %v368_v10 = vmul.f32 %v1928_v13, %v367_v55  ;;  %v344_v25 = vadd.f32 %v342_v0, %v314_v62  ;;  %v362_v24 = vadd.f32 %v360_v60, %v328_v42 }
 0x1fa   : > { %v371_v38 = vadd.f32 %v369_v43, %v335_v48  ;;  %v343_v33 = vadd.f32 %v341_v23, %v313_v41  ;;  %v352_v32 = vadd.f32 %v350_v8, %v320_v46 }
 0x1fb   : > { %v361_v51 = vadd.f32 %v359_v3, %v327_v22  ;;  %v370_v1 = vadd.f32 %v368_v10, %v334_v50 }
 0x1fc   : > { %1712 = vrot.lane.b32.xlu1 %v1576_v52, %s2101_s28  ;;  %v375_v7 = vadd.f32 %v371_v38, %v362_v24 }
 0x1fd   : > { %1740 = vrot.lane.b32.xlu2 %v1688_v61, %s2101_s28  ;;  %1736 = vrot.lane.b32.xlu0 %v1686_v30, %s2100_s30  ;;  %v353_v30 = vadd.f32 %v351_v12, %v321_v35  ;;  %v372_v61 = vadd.f32 %v352_v32, %v343_v33  ;;  %v374_v52 = vadd.f32 %v370_v1, %v361_v51 }
 0x1ff   : > { %v373_v54 = vadd.f32 %v353_v30, %v344_v25 }
 0x201   : > { %v377_v31 = vadd.f32 %v375_v7, %v373_v54 }
 0x204   : > { %1744 = vrot.lane.b32.xlu1 %v1690_v53, %s2102_s6 }
 0x205   : > { %1716 = vrot.lane.b32.xlu0 %v1578_v11, %s2102_s6 }
 0x23f   : > { %v3440_v4 = vpop.permute.xlu2 %1696 }
 0x247   : > { %v1729_v40 = vpop.permute.xlu2 %1728 }
 0x24f   : > { %v1709_v53 = vpop.permute.xlu2 %1708 }
 0x256   : > { %v3436_v29 = vpop.permute.xlu1 %1720 }
 0x257   : > { %v3442_v63 = vpop.permute.xlu0 %1692  ;;  %v1761_v11 = vsel %vm1747_vm4, %v3416_v27, %v3436_v29  ;;  %v379_v27 = vstv %s3475_s8  ;;  %v376_v29 = vadd.f32 %v374_v52, %v372_v61 }
 0x258   : > { %v1748_v17 = vsel %vm1747_vm4, %v3420_v6, %v3442_v63  ;;  %v381_v63 = vadd.f32 %v379_v27, %v377_v31 }
 0x259   : > { %v1750_v21 = vsel %vm1749_vm5, %v1748_v17, %v3440_v4  ;;  %v380_v2 = vadd.f32 %v379_v27, %v376_v29 }
 0x25e   : > { %v3454_v20 = vpop.permute.xlu1 %1700 }
 0x25f   : > { %v1725_v37 = vpop.permute.xlu0 %1724  ;;  %v1752_v16 = vsel %vm1751_vm6, %v1750_v21, %v3454_v20 }
 0x260   : > { %v1762_v34 = vsel %vm1749_vm5, %v1761_v11, %v1725_v37  ;;  %v1741_v37 = vpop.permute.xlu2 %1740 }
 0x261   : > { %v1763_v28 = vsel %vm1751_vm6, %v1762_v34, %v1729_v40 }
 0x266   : > { %v1733_v58 = vpop.permute.xlu1 %1732 }
 0x267   : > { %v1705_v19 = vpop.permute.xlu0 %1704  ;;  %v1764_v18 = vsel %vm1753_vm7, %v1763_v28, %v1733_v58 }
 0x268   : > { %v1754_v47 = vsel %vm1753_vm7, %v1752_v16, %v1705_v19 }
 0x269   : > { %v1756_v26 = vsel %vm1755_vm8, %v1754_v47, %v1709_v53 }
 0x26e   : > { %v1713_v5 = vpop.permute.xlu1 %1712 }
 0x26f   : > { %v1737_v44 = vpop.permute.xlu0 %1736  ;;  %v1758_v4 = vsel %vm1757_vm9, %v1756_v26, %v1713_v5 }
 0x270   : > { %v1765_v6 = vsel %vm1755_vm8, %v1764_v18, %v1737_v44 }
 0x271   : > { %v1766_v15 = vsel %vm1757_vm9, %v1765_v6, %v1741_v37 }
 0x276   : > { %v1745_v45 = vpop.permute.xlu1 %1744 }
 0x277   : > { %v1767_v39 = vsel %vm1759_vm10, %v1766_v15, %v1745_v45  ;;  %v1717_v20 = vpop.permute.xlu0 %1716 }
 0x278   : > { %v1769_v55 = vadd.f32 %v1767_v39, %v381_v63  ;;  %v1760_v9 = vsel %vm1759_vm10, %v1758_v4, %v1717_v20 }
 0x279   : > { %v1768_v14 = vadd.f32 %v1760_v9, %v380_v2 }
 0x27a   : > { %1771 = vst [vmem:[%s308_s27 + $0x8] sm:$0xff] %v1769_v55 }
 0x27b   : > { %1770 = vst [vmem:[%s308_s27] sm:$0xff] %v1768_v14 }
 0x27c PF: > { %s16_s23 = sadd.s32 1, %s2088_s23   ;;  %s3557_s17 = smov %s2068_s18 }
 0x27d   : > { %p13_p1 = scmp.ge.s32.totalorder %s16_s23, 6   ;;  %s3558_s18 = smov %s2204_s10 }
 0x27e   : > { %s3559_s19 = smov %s2080_s21  ;;  %s3560_s20 = smov %s2084_s22 }
 0x27f   : > { %s3561_s21 = smov %s3564_s24  ;;  %s3562_s22 = smov %s3568_s25 }
 0x280   :  { %15 = sbr.rel (!%p13_p1) target bundleno = 6 (0x6), region = 110 }
 0x285   :  { %1801 = vsyncpa [#allocation4], 1 }
 0x286   :  { %1803 = vsyncpa [#allocation4 + $0x1], 1 }

</bundles_post_ra>
